<compile_context>
chip_gen: v7x
topology: tpu7x:2x2x1
jax: 0.10.0
libtpu: 0.0.40
codegen_flags: <defaults>
</compile_context>

<pallas_src>
from functools import partial

import jax
import jax.numpy as jnp
from jax.experimental import pallas as pl
from jax.experimental.pallas import tpu as pltpu

IN_FEATS = 28 * 28          # 784
HIDDEN = 512
OUT_FEATS = 10
OUT_FEATS_PAD = 128         # lane-dense output width
NEG_BIG = -1e30             # padded-logit bias (exp underflows to exactly 0)


def _round_up(x, m):
    return ((x + m - 1) // m) * m


def mnist_mlp_kernel(x_ref, w1_ref, b1_ref, w2_ref, b2_ref, w3_ref, b3_ref,
                     o_ref):
    # fc1 + relu  (bf16 MXU inputs, f32 accumulate; elementwise in f32)
    h1 = jnp.dot(x_ref[...], w1_ref[...], preferred_element_type=jnp.float32)
    h1 = jnp.maximum(h1 + b1_ref[...], 0.0)
    # fc2 + relu
    h2 = jnp.dot(h1.astype(w2_ref.dtype), w2_ref[...],
                 preferred_element_type=jnp.float32)
    h2 = jnp.maximum(h2 + b2_ref[...], 0.0)
    # fc3 (padded to 128 lanes; padded columns carry a huge negative f32 bias)
    logits = jnp.dot(h2.astype(w3_ref.dtype), w3_ref[...],
                     preferred_element_type=jnp.float32)
    logits = logits + b3_ref[...]          # stays f32 (NEG_BIG safety)
    # numerically stable softmax over dim=1 (exp on EUP, reduce on XLU slots)
    m = jnp.max(logits, axis=1, keepdims=True)
    e = jnp.exp(logits - m)
    denom = jnp.sum(e, axis=1, keepdims=True)
    o_ref[...] = (e / denom).astype(o_ref.dtype)


@partial(jax.jit, static_argnames=("block_m", "use_bf16", "vmem_limit_bytes"))
def mnist_net_forward(x_nchw, params, *, block_m=512, use_bf16=True,
                      vmem_limit_bytes=None):
    """Forward pass of MnistNet (softmax probabilities).

    x_nchw: (B, 1, 28, 28) float32, NCHW like PyTorch.
    params: w1 (784,512), b1 (512,), w2 (512,512), b2 (512,), w3 (512,10),
            b3 (10,) -- weights stored (in, out) so the kernel computes
            x @ W + b (matches PyTorch's x @ W.T with W of shape (out, in)).
    Returns (B, 10) float32 probabilities.
    """
    B = x_nchw.shape[0]
    compute_dtype = jnp.bfloat16 if use_bf16 else jnp.float32

    # x.view(-1, 784); cast to bf16 BEFORE padding so prep moves bf16 bytes.
    x = x_nchw.reshape(B, IN_FEATS).astype(compute_dtype)

    # Batch tile size:
    #  * tiny batches: pad only to the bf16 sublane multiple (16), not 128.
    #  * larger batches: make the grid have >= 2 steps (v7x: 2 TCs over the
    #    "parallel" axis), capped at block_m (<=512 keeps v5e VMEM-safe).
    if B < 128:
        bm = _round_up(max(B, 1), 16)
    else:
        bm = min(block_m, max(128, _round_up(B, 256) // 2))
    b_pad = _round_up(B, bm)
    if b_pad != B:
        x = jnp.pad(x, ((0, b_pad - B), (0, 0)))

    # Weights: fc1 stays at its natural 784 rows (no K padding); fc3 columns
    # padded to 128 for a lane-dense output; all cast to the MXU dtype.
    w1 = params["w1"].astype(compute_dtype)
    w2 = params["w2"].astype(compute_dtype)
    w3 = jnp.pad(params["w3"].astype(jnp.float32),
                 ((0, 0), (0, OUT_FEATS_PAD - OUT_FEATS))).astype(compute_dtype)

    # Biases stay f32 as (1, N) rows; padded fc3 lanes get a huge negative
    # bias so they contribute exactly 0 to the softmax denominator.
    b1 = params["b1"].reshape(1, -1).astype(jnp.float32)
    b2 = params["b2"].reshape(1, -1).astype(jnp.float32)
    b3 = jnp.full((1, OUT_FEATS_PAD), NEG_BIG, jnp.float32)
    b3 = b3.at[0, :OUT_FEATS].set(params["b3"].astype(jnp.float32))

    grid = (b_pad // bm,)
    out = pl.pallas_call(
        mnist_mlp_kernel,
        out_shape=jax.ShapeDtypeStruct((b_pad, OUT_FEATS_PAD), jnp.float32),
        grid=grid,
        in_specs=[
            pl.BlockSpec((bm, IN_FEATS), lambda i: (i, 0)),           # x tile (full 784 lanes)
            pl.BlockSpec((IN_FEATS, HIDDEN), lambda i: (0, 0)),       # w1 resident
            pl.BlockSpec((1, HIDDEN), lambda i: (0, 0)),              # b1 resident
            pl.BlockSpec((HIDDEN, HIDDEN), lambda i: (0, 0)),         # w2 resident
            pl.BlockSpec((1, HIDDEN), lambda i: (0, 0)),              # b2 resident
            pl.BlockSpec((HIDDEN, OUT_FEATS_PAD), lambda i: (0, 0)),  # w3 resident
            pl.BlockSpec((1, OUT_FEATS_PAD), lambda i: (0, 0)),       # b3 resident
        ],
        out_specs=pl.BlockSpec((bm, OUT_FEATS_PAD), lambda i: (i, 0)),
        compiler_params=pltpu.CompilerParams(
            dimension_semantics=("parallel",),
            vmem_limit_bytes=vmem_limit_bytes),
    )(x, w1, b1, w2, b2, w3, b3)

    return out[:B, :OUT_FEATS]


def mnist_net_reference(x_nchw, params):
    """Pure-JAX f32 reference matching the PyTorch forward."""
    x = x_nchw.reshape(x_nchw.shape[0], IN_FEATS).astype(jnp.float32)
    h1 = jax.nn.relu(x @ params["w1"] + params["b1"])
    h2 = jax.nn.relu(h1 @ params["w2"] + params["b2"])
    return jax.nn.softmax(h2 @ params["w3"] + params["b3"], axis=1)


def init_params(key):
    """Deterministic init mimicking PyTorch Linear default (U[-1/sqrt(fan_in), +])."""
    ks = jax.random.split(key, 6)

    def linear(kw, kb, fan_in, fan_out):
        bound = 1.0 / jnp.sqrt(fan_in)
        w = jax.random.uniform(kw, (fan_in, fan_out), jnp.float32, -bound, bound)
        b = jax.random.uniform(kb, (fan_out,), jnp.float32, -bound, bound)
        return w, b

    w1, b1 = linear(ks[0], ks[1], IN_FEATS, HIDDEN)
    w2, b2 = linear(ks[2], ks[3], HIDDEN, HIDDEN)
    w3, b3 = linear(ks[4], ks[5], HIDDEN, OUT_FEATS)
    return {"w1": w1, "b1": b1, "w2": w2, "b2": b2, "w3": w3, "b3": b3}


if __name__ == "__main__":
    key = jax.random.PRNGKey(0)
    k_params, k_x = jax.random.split(key)

    params = init_params(k_params)
    # MNIST-like input, NCHW, small batch (wrapper pads batch only to 16 here)
    x = jax.random.normal(k_x, (8, 1, 28, 28), dtype=jnp.float32)

    out = mnist_net_forward(x, params)
    out = jax.block_until_ready(out)

    assert out.shape == (8, 10)
    # softmax rows sum to ~1 (exact divide in f32)
    row_sums = jnp.sum(out, axis=1)
    assert bool(jnp.all(jnp.abs(row_sums - 1.0) < 1e-3)), row_sums
    # matches pure-JAX f32 reference up to bf16 matmul error
    ref = mnist_net_reference(x, params)
    assert bool(jnp.all(jnp.abs(out - ref) < 5e-2)), jnp.max(jnp.abs(out - ref))

    print("KERNEL_OK")
</pallas_src>

<mosaic_0001>
module attributes {stable_mosaic.version = 11 : i64} {
  func.func @mnist_mlp_kernel(%arg0: i32, %arg1: memref<16x784xbf16, #tpu.memory_space<vmem>>, %arg2: memref<784x512xbf16, #tpu.memory_space<vmem>>, %arg3: memref<1x512xf32, #tpu.memory_space<vmem>>, %arg4: memref<512x512xbf16, #tpu.memory_space<vmem>>, %arg5: memref<1x512xf32, #tpu.memory_space<vmem>>, %arg6: memref<512x128xbf16, #tpu.memory_space<vmem>>, %arg7: memref<1x128xf32, #tpu.memory_space<vmem>>, %arg8: memref<16x128xf32, #tpu.memory_space<vmem>>) attributes {dimension_semantics = [#tpu.dimension_semantics<parallel>], iteration_bounds = array<i64: 1>, scalar_prefetch = 0 : i64, scratch_operands = 0 : i64, tpu.core_type = #tpu.core_type<tc>, window_params = [{transform_indices = @transform_0, window_bounds = array<i64: 16, 784>}, {pipeline_mode = #tpu.pipeline_mode<synchronous>, transform_indices = @transform_1, window_bounds = array<i64: 784, 512>}, {pipeline_mode = #tpu.pipeline_mode<synchronous>, transform_indices = @transform_2, window_bounds = array<i64: 1, 512>}, {pipeline_mode = #tpu.pipeline_mode<synchronous>, transform_indices = @transform_3, window_bounds = array<i64: 512, 512>}, {pipeline_mode = #tpu.pipeline_mode<synchronous>, transform_indices = @transform_4, window_bounds = array<i64: 1, 512>}, {pipeline_mode = #tpu.pipeline_mode<synchronous>, transform_indices = @transform_5, window_bounds = array<i64: 512, 128>}, {pipeline_mode = #tpu.pipeline_mode<synchronous>, transform_indices = @transform_6, window_bounds = array<i64: 1, 128>}, {transform_indices = @transform_7, window_bounds = array<i64: 16, 128>}]} {
    %c0 = arith.constant 0 : index
    %c0_0 = arith.constant 0 : index
    %0 = vector.load %arg1[%c0, %c0_0] : memref<16x784xbf16, #tpu.memory_space<vmem>>, vector<16x784xbf16>
    %c0_1 = arith.constant 0 : index
    %c0_2 = arith.constant 0 : index
    %1 = vector.load %arg2[%c0_1, %c0_2] : memref<784x512xbf16, #tpu.memory_space<vmem>>, vector<784x512xbf16>
    %cst = arith.constant dense<0.000000e+00> : vector<16x512xf32>
    %2 = tpu.matmul %0, %1, %cst {dimension_numbers = #tpu.dot_dimension_numbers<[1], [0], [0], [1], [0, 0, 1, 1], [], []>} : vector<16x784xbf16>, vector<784x512xbf16>, vector<16x512xf32> -> vector<16x512xf32>
    %c0_3 = arith.constant 0 : index
    %c0_4 = arith.constant 0 : index
    %3 = vector.load %arg3[%c0_3, %c0_4] : memref<1x512xf32, #tpu.memory_space<vmem>>, vector<1x512xf32>
    %4 = vector.broadcast %3 : vector<1x512xf32> to vector<16x512xf32>
    %5 = arith.addf %2, %4 : vector<16x512xf32>
    %cst_5 = arith.constant 0.000000e+00 : f32
    %6 = vector.broadcast %cst_5 : f32 to vector<16x512xf32>
    %7 = arith.maximumf %5, %6 : vector<16x512xf32>
    %8 = arith.truncf %7 : vector<16x512xf32> to vector<16x512xbf16>
    %c0_6 = arith.constant 0 : index
    %c0_7 = arith.constant 0 : index
    %9 = vector.load %arg4[%c0_6, %c0_7] : memref<512x512xbf16, #tpu.memory_space<vmem>>, vector<512x512xbf16>
    %cst_8 = arith.constant dense<0.000000e+00> : vector<16x512xf32>
    %10 = tpu.matmul %8, %9, %cst_8 {dimension_numbers = #tpu.dot_dimension_numbers<[1], [0], [0], [1], [0, 0, 1, 1], [], []>} : vector<16x512xbf16>, vector<512x512xbf16>, vector<16x512xf32> -> vector<16x512xf32>
    %c0_9 = arith.constant 0 : index
    %c0_10 = arith.constant 0 : index
    %11 = vector.load %arg5[%c0_9, %c0_10] : memref<1x512xf32, #tpu.memory_space<vmem>>, vector<1x512xf32>
    %12 = vector.broadcast %11 : vector<1x512xf32> to vector<16x512xf32>
    %13 = arith.addf %10, %12 : vector<16x512xf32>
    %cst_11 = arith.constant 0.000000e+00 : f32
    %14 = vector.broadcast %cst_11 : f32 to vector<16x512xf32>
    %15 = arith.maximumf %13, %14 : vector<16x512xf32>
    %16 = arith.truncf %15 : vector<16x512xf32> to vector<16x512xbf16>
    %c0_12 = arith.constant 0 : index
    %c0_13 = arith.constant 0 : index
    %17 = vector.load %arg6[%c0_12, %c0_13] : memref<512x128xbf16, #tpu.memory_space<vmem>>, vector<512x128xbf16>
    %cst_14 = arith.constant dense<0.000000e+00> : vector<16x128xf32>
    %18 = tpu.matmul %16, %17, %cst_14 {dimension_numbers = #tpu.dot_dimension_numbers<[1], [0], [0], [1], [0, 0, 1, 1], [], []>} : vector<16x512xbf16>, vector<512x128xbf16>, vector<16x128xf32> -> vector<16x128xf32>
    %c0_15 = arith.constant 0 : index
    %c0_16 = arith.constant 0 : index
    %19 = vector.load %arg7[%c0_15, %c0_16] : memref<1x128xf32, #tpu.memory_space<vmem>>, vector<1x128xf32>
    %20 = vector.broadcast %19 : vector<1x128xf32> to vector<16x128xf32>
    %21 = arith.addf %18, %20 : vector<16x128xf32>
    %cst_17 = arith.constant dense<0xFF800000> : vector<16xf32>
    %22 = vector.multi_reduction <maximumf>, %21, %cst_17 [1] : vector<16x128xf32> to vector<16xf32>
    %23 = vector.shape_cast %22 : vector<16xf32> to vector<16x1xf32>
    %24 = vector.broadcast %23 : vector<16x1xf32> to vector<16x128xf32>
    %25 = arith.subf %21, %24 : vector<16x128xf32>
    %26 = math.exp %25 : vector<16x128xf32>
    %cst_18 = arith.constant dense<0.000000e+00> : vector<16xf32>
    %27 = vector.multi_reduction <add>, %26, %cst_18 [1] : vector<16x128xf32> to vector<16xf32>
    %28 = vector.shape_cast %27 : vector<16xf32> to vector<16x1xf32>
    %29 = vector.broadcast %28 : vector<16x1xf32> to vector<16x128xf32>
    %30 = arith.divf %26, %29 : vector<16x128xf32>
    %c0_19 = arith.constant 0 : index
    %c0_20 = arith.constant 0 : index
    %31 = vector.load %arg8[%c0_19, %c0_20] : memref<16x128xf32, #tpu.memory_space<vmem>>, vector<16x128xf32>
    tpu.vector_store %arg8[%c0_19, %c0_20], %30 {strides = array<i32>} : memref<16x128xf32, #tpu.memory_space<vmem>>, vector<16x128xf32>,
    return
  }
  func.func @transform_0(%arg0: i32) -> (i32, i32) {
    %c0_i32 = arith.constant 0 : i32
    %c0_i32_0 = arith.constant 0 : i32
    return %arg0, %c0_i32 : i32, i32
  }
  func.func @transform_1(%arg0: i32) -> (i32, i32) {
    %c0_i32 = arith.constant 0 : i32
    %c0_i32_0 = arith.constant 0 : i32
    %c0_i32_1 = arith.constant 0 : i32
    return %c0_i32, %c0_i32_0 : i32, i32
  }
  func.func @transform_2(%arg0: i32) -> (i32, i32) {
    %c0_i32 = arith.constant 0 : i32
    %c0_i32_0 = arith.constant 0 : i32
    %c0_i32_1 = arith.constant 0 : i32
    return %c0_i32, %c0_i32_0 : i32, i32
  }
  func.func @transform_3(%arg0: i32) -> (i32, i32) {
    %c0_i32 = arith.constant 0 : i32
    %c0_i32_0 = arith.constant 0 : i32
    %c0_i32_1 = arith.constant 0 : i32
    return %c0_i32, %c0_i32_0 : i32, i32
  }
  func.func @transform_4(%arg0: i32) -> (i32, i32) {
    %c0_i32 = arith.constant 0 : i32
    %c0_i32_0 = arith.constant 0 : i32
    %c0_i32_1 = arith.constant 0 : i32
    return %c0_i32, %c0_i32_0 : i32, i32
  }
  func.func @transform_5(%arg0: i32) -> (i32, i32) {
    %c0_i32 = arith.constant 0 : i32
    %c0_i32_0 = arith.constant 0 : i32
    %c0_i32_1 = arith.constant 0 : i32
    return %c0_i32, %c0_i32_0 : i32, i32
  }
  func.func @transform_6(%arg0: i32) -> (i32, i32) {
    %c0_i32 = arith.constant 0 : i32
    %c0_i32_0 = arith.constant 0 : i32
    %c0_i32_1 = arith.constant 0 : i32
    return %c0_i32, %c0_i32_0 : i32, i32
  }
  func.func @transform_7(%arg0: i32) -> (i32, i32) {
    %c0_i32 = arith.constant 0 : i32
    %c0_i32_0 = arith.constant 0 : i32
    return %arg0, %c0_i32 : i32, i32
  }
}

</mosaic_0001>

<bundles_post_ra>
// kernel: mnist_net_forward.1
= control target key start
LH: loop header
LB: loop body
LE: loop exit
PB: predicated region body
PF: predicated region fallthrough
CT: control target
= control target key end

     0   :  { %vm1268_vm0 = vcmask 130048   ;;  %s5137_s1 = inlined_call_operand.vmem [shape: bf16[784,512], index: 1, kind: input, shape index: {}]   ;;  %s5138_s0 = inlined_call_operand.vmem [shape: bf16[16,784], index: 0, kind: input, shape index: {}]   ;;  %s5139_s3 = inlined_call_operand.vmem [shape: bf16[512,512], index: 3, kind: input, shape index: {}]   ;;  %s5140_s5 = inlined_call_operand.vmem [shape: bf16[512,128], index: 5, kind: input, shape index: {}]   ;;  %s5141_s2 = inlined_call_operand.vmem [shape: f32[1,512], index: 2, kind: input, shape index: {}]   ;;  %s5142_s4 = inlined_call_operand.vmem [shape: f32[1,512], index: 4, kind: input, shape index: {}]   ;;  %s5143_s6 = inlined_call_operand.vmem [shape: f32[1,128], index: 6, kind: input, shape index: {}]   ;;  %s5144_s7 = inlined_call_operand.vmem [shape: f32[16,128], index: 7, kind: output, shape index: {}]  }
   0x1   :  { %v3430_v0 = vld [vmem:[%s5137_s1 + $0x4] ss:$16 sps:$4 sm:$0xff]   ;;  %v3432_v1 = vld [vmem:[%s5137_s1 + $0xc] ss:$16 sps:$4 sm:$0xff]   ;;  %v3434_v2 = vld [vmem:[%s5137_s1] ss:$16 sps:$4 sm:$0xff]  }
   0x2   :  { %1272 = vmatprep.subr.bf16.mxu0 %v3430_v0  ;;  %v3435_v3 = vld [vmem:[%s5137_s1 + $0x8] ss:$16 sps:$4 sm:$0xff]   ;;  %1444 = vmatprep.subr.bf16.mxu1 %v3432_v1  ;;  %v3436_v4 = vld [vmem:[%s5137_s1 + $0x24] ss:$16 sps:$4 sm:$0xff]   ;;  %v3438_v5 = vld [vmem:[%s5137_s1 + $0x2c] ss:$16 sps:$4 sm:$0xff]  }
   0x3   :  { %1273 = vmatpush1.bf16.msra.mxu0 %v3434_v2  ;;  %1445 = vmatpush1.bf16.msra.mxu1 %v3435_v3  ;;  %v3440_v6 = vld [vmem:[%s5137_s1 + $0x20] ss:$16 sps:$4 sm:$0xff]   ;;  %v3441_v7 = vld [vmem:[%s5137_s1 + $0x28] ss:$16 sps:$4 sm:$0xff]   ;;  %v3442_v8 = vld [vmem:[%s5137_s1 + $0x44] ss:$16 sps:$4 sm:$0xff]  }
   0x4   :  { %1274 = vmatprep.subr.bf16.mxu0 %v3436_v4  ;;  %1446 = vmatprep.subr.bf16.mxu1 %v3438_v5  ;;  %v3444_v9 = vld [vmem:[%s5137_s1 + $0x4c] ss:$16 sps:$4 sm:$0xff]   ;;  %v3446_v10 = vld [vmem:[%s5137_s1 + $0x40] ss:$16 sps:$4 sm:$0xff]   ;;  %v3447_v11 = vld [vmem:[%s5137_s1 + $0x48] ss:$16 sps:$4 sm:$0xff]  }
   0x5   :  { %v3448_v12 = vld [vmem:[%s5137_s1 + $0x64] ss:$16 sps:$4 sm:$0xff]   ;;  %v3450_v13 = vld [vmem:[%s5137_s1 + $0x6c] ss:$16 sps:$4 sm:$0xff]   ;;  %v3452_v14 = vld [vmem:[%s5137_s1 + $0x60] ss:$16 sps:$4 sm:$0xff]  }
   0x6   :  { %v3453_v15 = vld [vmem:[%s5137_s1 + $0x68] ss:$16 sps:$4 sm:$0xff]   ;;  %v3454_v16 = vld [vmem:[%s5137_s1 + $0x84] ss:$16 sps:$4 sm:$0xff]   ;;  %v3456_v17 = vld [vmem:[%s5137_s1 + $0x8c] ss:$16 sps:$4 sm:$0xff]  }
   0x7   :  { %1275 = vmatpush1.bf16.msra.mxu0 %v3440_v6  ;;  %1447 = vmatpush1.bf16.msra.mxu1 %v3441_v7  ;;  %v3458_v18 = vld [vmem:[%s5137_s1 + $0x80] ss:$16 sps:$4 sm:$0xff]   ;;  %v3459_v19 = vld [vmem:[%s5137_s1 + $0x88] ss:$16 sps:$4 sm:$0xff]   ;;  %v3460_v20 = vld [vmem:[%s5137_s1 + $0xa4] ss:$16 sps:$4 sm:$0xff]  }
   0x8   :  { %1276 = vmatprep.subr.bf16.mxu0 %v3442_v8  ;;  %1448 = vmatprep.subr.bf16.mxu1 %v3444_v9  ;;  %v3462_v21 = vld [vmem:[%s5137_s1 + $0xac] ss:$16 sps:$4 sm:$0xff]   ;;  %v3464_v22 = vld [vmem:[%s5137_s1 + $0xa0] ss:$16 sps:$4 sm:$0xff]   ;;  %v3465_v23 = vld [vmem:[%s5137_s1 + $0xa8] ss:$16 sps:$4 sm:$0xff]  }
   0x9   :  { %v3466_v24 = vld [vmem:[%s5137_s1 + $0xc4] ss:$16 sps:$4 sm:$0xff]   ;;  %v3468_v25 = vld [vmem:[%s5137_s1 + $0xcc] ss:$16 sps:$4 sm:$0xff]   ;;  %v3470_v26 = vld [vmem:[%s5137_s1 + $0xc0] ss:$16 sps:$4 sm:$0xff]  }
   0xa   :  { %v3471_v27 = vld [vmem:[%s5137_s1 + $0xc8] ss:$16 sps:$4 sm:$0xff]   ;;  %v3472_v28 = vld [vmem:[%s5137_s1 + $0xe4] ss:$16 sps:$4 sm:$0xff]   ;;  %v3474_v29 = vld [vmem:[%s5137_s1 + $0xec] ss:$16 sps:$4 sm:$0xff]  }
   0xb   :  { %1277 = vmatpush1.bf16.msra.mxu0 %v3446_v10  ;;  %1449 = vmatpush1.bf16.msra.mxu1 %v3447_v11  ;;  %v3476_v30 = vld [vmem:[%s5137_s1 + $0xe0] ss:$16 sps:$4 sm:$0xff]   ;;  %v3477_v31 = vld [vmem:[%s5137_s1 + $0xe8] ss:$16 sps:$4 sm:$0xff]   ;;  %v3478_v32 = vld [vmem:[%s5137_s1 + $0x104] ss:$16 sps:$4 sm:$0xff]  }
   0xc   :  { %1278 = vmatprep.subr.bf16.mxu0 %v3448_v12  ;;  %1450 = vmatprep.subr.bf16.mxu1 %v3450_v13  ;;  %v3480_v33 = vld [vmem:[%s5137_s1 + $0x10c] ss:$16 sps:$4 sm:$0xff]   ;;  %v3482_v34 = vld [vmem:[%s5137_s1 + $0x100] ss:$16 sps:$4 sm:$0xff]   ;;  %v3483_v35 = vld [vmem:[%s5137_s1 + $0x108] ss:$16 sps:$4 sm:$0xff]  }
   0xd   :  { %v3484_v36 = vld [vmem:[%s5137_s1 + $0x124] ss:$16 sps:$4 sm:$0xff]   ;;  %v3486_v37 = vld [vmem:[%s5137_s1 + $0x12c] ss:$16 sps:$4 sm:$0xff]   ;;  %v3488_v38 = vld [vmem:[%s5137_s1 + $0x120] ss:$16 sps:$4 sm:$0xff]  }
   0xe   :  { %v3489_v39 = vld [vmem:[%s5137_s1 + $0x128] ss:$16 sps:$4 sm:$0xff]   ;;  %v3490_v40 = vld [vmem:[%s5137_s1 + $0x144] ss:$16 sps:$4 sm:$0xff]   ;;  %v3492_v41 = vld [vmem:[%s5137_s1 + $0x14c] ss:$16 sps:$4 sm:$0xff]  }
   0xf   :  { %1279 = vmatpush1.bf16.msra.mxu0 %v3452_v14  ;;  %1451 = vmatpush1.bf16.msra.mxu1 %v3453_v15  ;;  %v3494_v42 = vld [vmem:[%s5137_s1 + $0x140] ss:$16 sps:$4 sm:$0xff]   ;;  %v3495_v43 = vld [vmem:[%s5137_s1 + $0x148] ss:$16 sps:$4 sm:$0xff]   ;;  %v3496_v44 = vld [vmem:[%s5137_s1 + $0x164] ss:$16 sps:$4 sm:$0xff]  }
  0x10   :  { %1280 = vmatprep.subr.bf16.mxu0 %v3454_v16  ;;  %1452 = vmatprep.subr.bf16.mxu1 %v3456_v17  ;;  %v3498_v45 = vld [vmem:[%s5137_s1 + $0x16c] ss:$16 sps:$4 sm:$0xff]   ;;  %v3500_v46 = vld [vmem:[%s5137_s1 + $0x160] ss:$16 sps:$4 sm:$0xff]   ;;  %v3501_v47 = vld [vmem:[%s5137_s1 + $0x168] ss:$16 sps:$4 sm:$0xff]  }
  0x11   :  { %v3528_v48 = vld [vmem:[%s5138_s0 + $0x4] ss:$28 sps:$4 sm:$0xff]   ;;  %v3504_v50 = vld [vmem:[%s5137_s1 + $0x18c] ss:$16 sps:$4 sm:$0xff]   ;;  %v3507_v52 = vld [vmem:[%s5137_s1 + $0x188] ss:$16 sps:$4 sm:$0xff]  }
  0x12   :  { %v3502_v49 = vld [vmem:[%s5137_s1 + $0x184] ss:$16 sps:$4 sm:$0xff]   ;;  %1304 = vmatprep.mubr.bf16.mxu0 %v3528_v48  ;;  %1476 = vmatprep.mubr.bf16.mxu1 %v3528_v48  ;;  %v3506_v51 = vld [vmem:[%s5137_s1 + $0x180] ss:$16 sps:$4 sm:$0xff]   ;;  %v3510_v54 = vld [vmem:[%s5137_s1 + $0x1ac] ss:$16 sps:$4 sm:$0xff]  }
  0x13   :  { %1281 = vmatpush1.bf16.msra.mxu0 %v3458_v18  ;;  %1453 = vmatpush1.bf16.msra.mxu1 %v3459_v19  ;;  %v3508_v53 = vld [vmem:[%s5137_s1 + $0x1a4] ss:$16 sps:$4 sm:$0xff]   ;;  %v3512_v55 = vld [vmem:[%s5137_s1 + $0x1a0] ss:$16 sps:$4 sm:$0xff]   ;;  %v3513_v56 = vld [vmem:[%s5137_s1 + $0x1a8] ss:$16 sps:$4 sm:$0xff]  }
  0x14   :  { %1282 = vmatprep.subr.bf16.mxu0 %v3460_v20  ;;  %1454 = vmatprep.subr.bf16.mxu1 %v3462_v21  ;;  %v3514_v57 = vld [vmem:[%s5137_s1 + $0x1c4] ss:$16 sps:$4 sm:$0xff]   ;;  %v3516_v58 = vld [vmem:[%s5137_s1 + $0x1cc] ss:$16 sps:$4 sm:$0xff]   ;;  %v3518_v59 = vld [vmem:[%s5137_s1 + $0x1c0] ss:$16 sps:$4 sm:$0xff]  }
  0x15   :  { %v3519_v60 = vld [vmem:[%s5137_s1 + $0x1c8] ss:$16 sps:$4 sm:$0xff]   ;;  %v3520_v61 = vld [vmem:[%s5137_s1 + $0x1e4] ss:$16 sps:$4 sm:$0xff]   ;;  %v3522_v62 = vld [vmem:[%s5137_s1 + $0x1ec] ss:$16 sps:$4 sm:$0xff]  }
  0x16   :  { %v3524_v63 = vld [vmem:[%s5137_s1 + $0x1e0] ss:$16 sps:$4 sm:$0xff]   ;;  %v3525_v0 = vld [vmem:[%s5137_s1 + $0x1e8] ss:$16 sps:$4 sm:$0xff]   ;;  %v3531_v1 = vld [vmem:[%s5137_s1 + $0x204] ss:$16 sps:$4 sm:$0xff]  }
  0x17   :  { %1283 = vmatpush1.bf16.msra.mxu0 %v3464_v22  ;;  %1455 = vmatpush1.bf16.msra.mxu1 %v3465_v23  ;;  %v3534_v2 = vld [vmem:[%s5137_s1 + $0x20c] ss:$16 sps:$4 sm:$0xff]   ;;  %v3529_v4 = vld [vmem:[%s5137_s1 + $0x200] ss:$16 sps:$4 sm:$0xff]   ;;  %v3532_v5 = vld [vmem:[%s5137_s1 + $0x208] ss:$16 sps:$4 sm:$0xff]  }
  0x18   :  { %1284 = vmatprep.subr.bf16.mxu0 %v3466_v24  ;;  %1456 = vmatprep.subr.bf16.mxu1 %v3468_v25  ;;  %v3526_v3 = vld [vmem:[%s5138_s0] ss:$28 sps:$4 sm:$0xff]   ;;  %v3537_v6 = vld [vmem:[%s5137_s1 + $0x224] ss:$16 sps:$4 sm:$0xff]   ;;  %v3538_v9 = vld [vmem:[%s5137_s1 + $0x228] ss:$16 sps:$4 sm:$0xff]  }
  0x19   :  { %v3540_v7 = vld [vmem:[%s5137_s1 + $0x22c] ss:$16 sps:$4 sm:$0xff]   ;;  %v3535_v8 = vld [vmem:[%s5137_s1 + $0x220] ss:$16 sps:$4 sm:$0xff]   ;;  %v3543_v10 = vld [vmem:[%s5137_s1 + $0x244] ss:$16 sps:$4 sm:$0xff]  }
  0x1a   :  { %v3546_v11 = vld [vmem:[%s5137_s1 + $0x24c] ss:$16 sps:$4 sm:$0xff]   ;;  %v3541_v12 = vld [vmem:[%s5137_s1 + $0x240] ss:$16 sps:$4 sm:$0xff]   ;;  %v3544_v13 = vld [vmem:[%s5137_s1 + $0x248] ss:$16 sps:$4 sm:$0xff]  }
  0x1b   :  { %1285 = vmatpush1.bf16.msra.mxu0 %v3470_v26  ;;  %1457 = vmatpush1.bf16.msra.mxu1 %v3471_v27  ;;  %v3549_v14 = vld [vmem:[%s5137_s1 + $0x264] ss:$16 sps:$4 sm:$0xff]   ;;  %v3552_v15 = vld [vmem:[%s5137_s1 + $0x26c] ss:$16 sps:$4 sm:$0xff]   ;;  %v3547_v16 = vld [vmem:[%s5137_s1 + $0x260] ss:$16 sps:$4 sm:$0xff]  }
  0x1c   :  { %1286 = vmatprep.subr.bf16.mxu0 %v3472_v28  ;;  %1458 = vmatprep.subr.bf16.mxu1 %v3474_v29  ;;  %v3550_v17 = vld [vmem:[%s5137_s1 + $0x268] ss:$16 sps:$4 sm:$0xff]   ;;  %v3555_v18 = vld [vmem:[%s5137_s1 + $0x284] ss:$16 sps:$4 sm:$0xff]   ;;  %v3558_v19 = vld [vmem:[%s5137_s1 + $0x28c] ss:$16 sps:$4 sm:$0xff]  }
  0x1d   :  { %v3553_v20 = vld [vmem:[%s5137_s1 + $0x280] ss:$16 sps:$4 sm:$0xff]   ;;  %v3556_v21 = vld [vmem:[%s5137_s1 + $0x288] ss:$16 sps:$4 sm:$0xff]   ;;  %v3561_v22 = vld [vmem:[%s5137_s1 + $0x2a4] ss:$16 sps:$4 sm:$0xff]  }
  0x1e   :  { %v3564_v23 = vld [vmem:[%s5137_s1 + $0x2ac] ss:$16 sps:$4 sm:$0xff]   ;;  %v3559_v24 = vld [vmem:[%s5137_s1 + $0x2a0] ss:$16 sps:$4 sm:$0xff]   ;;  %v3562_v25 = vld [vmem:[%s5137_s1 + $0x2a8] ss:$16 sps:$4 sm:$0xff]  }
  0x1f   :  { %1287 = vmatpush1.bf16.msra.mxu0 %v3476_v30  ;;  %1459 = vmatpush1.bf16.msra.mxu1 %v3477_v31  ;;  %v3567_v26 = vld [vmem:[%s5137_s1 + $0x2c4] ss:$16 sps:$4 sm:$0xff]   ;;  %v3570_v27 = vld [vmem:[%s5137_s1 + $0x2cc] ss:$16 sps:$4 sm:$0xff]   ;;  %v3565_v28 = vld [vmem:[%s5137_s1 + $0x2c0] ss:$16 sps:$4 sm:$0xff]  }
  0x20   :  { %1288 = vmatprep.subr.bf16.mxu0 %v3478_v32  ;;  %1460 = vmatprep.subr.bf16.mxu1 %v3480_v33  ;;  %v3568_v29 = vld [vmem:[%s5137_s1 + $0x2c8] ss:$16 sps:$4 sm:$0xff]   ;;  %v3573_v31 = vld [vmem:[%s5137_s1 + $0x2e4] ss:$16 sps:$4 sm:$0xff]   ;;  %v3576_v32 = vld [vmem:[%s5137_s1 + $0x2ec] ss:$16 sps:$4 sm:$0xff]  }
  0x21   :  { %v3627_v30 = vld [vmem:[%s5138_s0 + $0xc] ss:$28 sps:$4 sm:$0xff]   ;;  %v3571_v33 = vld [vmem:[%s5137_s1 + $0x2e0] ss:$16 sps:$4 sm:$0xff]  }
  0x22   :  { %v3600_v48 = vld [vmem:[%s5137_s1 + $0x36c] ss:$16 sps:$4 sm:$0xff]  }
  0x23   :  { %1289 = vmatpush1.bf16.msra.mxu0 %v3482_v34  ;;  %1461 = vmatpush1.bf16.msra.mxu1 %v3483_v35  ;;  %v3574_v34 = vld [vmem:[%s5137_s1 + $0x2e8] ss:$16 sps:$4 sm:$0xff]   ;;  %v3579_v35 = vld [vmem:[%s5137_s1 + $0x304] ss:$16 sps:$4 sm:$0xff]  }
  0x24   :  { %1290 = vmatprep.subr.bf16.mxu0 %v3484_v36  ;;  %1462 = vmatprep.subr.bf16.mxu1 %v3486_v37  ;;  %v3582_v36 = vld [vmem:[%s5137_s1 + $0x30c] ss:$16 sps:$4 sm:$0xff]   ;;  %v3577_v37 = vld [vmem:[%s5137_s1 + $0x300] ss:$16 sps:$4 sm:$0xff]  }
  0x27   :  { %1291 = vmatpush1.bf16.msra.mxu0 %v3488_v38  ;;  %1463 = vmatpush1.bf16.msra.mxu1 %v3489_v39  ;;  %v3580_v38 = vld [vmem:[%s5137_s1 + $0x308] ss:$16 sps:$4 sm:$0xff]   ;;  %v3585_v39 = vld [vmem:[%s5137_s1 + $0x324] ss:$16 sps:$4 sm:$0xff]  }
  0x28   :  { %1292 = vmatprep.subr.bf16.mxu0 %v3490_v40  ;;  %1464 = vmatprep.subr.bf16.mxu1 %v3492_v41  ;;  %v3588_v40 = vld [vmem:[%s5137_s1 + $0x32c] ss:$16 sps:$4 sm:$0xff]   ;;  %v3583_v41 = vld [vmem:[%s5137_s1 + $0x320] ss:$16 sps:$4 sm:$0xff]  }
  0x2b   :  { %1293 = vmatpush1.bf16.msra.mxu0 %v3494_v42  ;;  %1465 = vmatpush1.bf16.msra.mxu1 %v3495_v43  ;;  %v3586_v42 = vld [vmem:[%s5137_s1 + $0x328] ss:$16 sps:$4 sm:$0xff]   ;;  %v3591_v43 = vld [vmem:[%s5137_s1 + $0x344] ss:$16 sps:$4 sm:$0xff]  }
  0x2c   :  { %1294 = vmatprep.subr.bf16.mxu0 %v3496_v44  ;;  %1466 = vmatprep.subr.bf16.mxu1 %v3498_v45  ;;  %v3594_v44 = vld [vmem:[%s5137_s1 + $0x34c] ss:$16 sps:$4 sm:$0xff]   ;;  %v3589_v45 = vld [vmem:[%s5137_s1 + $0x340] ss:$16 sps:$4 sm:$0xff]  }
  0x2f   :  { %1295 = vmatpush1.bf16.msra.mxu0 %v3500_v46  ;;  %1467 = vmatpush1.bf16.msra.mxu1 %v3501_v47  ;;  %v3592_v46 = vld [vmem:[%s5137_s1 + $0x348] ss:$16 sps:$4 sm:$0xff]   ;;  %v3597_v47 = vld [vmem:[%s5137_s1 + $0x364] ss:$16 sps:$4 sm:$0xff]  }
  0x30   :  { %1296 = vmatprep.subr.bf16.mxu0 %v3502_v49  ;;  %1468 = vmatprep.subr.bf16.mxu1 %v3504_v50  ;;  %v3595_v49 = vld [vmem:[%s5137_s1 + $0x360] ss:$16 sps:$4 sm:$0xff]   ;;  %v3598_v50 = vld [vmem:[%s5137_s1 + $0x368] ss:$16 sps:$4 sm:$0xff]  }
  0x33   :  { %1297 = vmatpush1.bf16.msra.mxu0 %v3506_v51  ;;  %1469 = vmatpush1.bf16.msra.mxu1 %v3507_v52  ;;  %v3603_v51 = vld [vmem:[%s5137_s1 + $0x384] ss:$16 sps:$4 sm:$0xff]   ;;  %v3606_v52 = vld [vmem:[%s5137_s1 + $0x38c] ss:$16 sps:$4 sm:$0xff]  }
  0x34   :  { %1298 = vmatprep.subr.bf16.mxu0 %v3508_v53  ;;  %1470 = vmatprep.subr.bf16.mxu1 %v3510_v54  ;;  %v3601_v53 = vld [vmem:[%s5137_s1 + $0x380] ss:$16 sps:$4 sm:$0xff]   ;;  %v3604_v54 = vld [vmem:[%s5137_s1 + $0x388] ss:$16 sps:$4 sm:$0xff]  }
  0x37   :  { %1299 = vmatpush1.bf16.msra.mxu0 %v3512_v55  ;;  %1471 = vmatpush1.bf16.msra.mxu1 %v3513_v56  ;;  %v3609_v55 = vld [vmem:[%s5137_s1 + $0x3a4] ss:$16 sps:$4 sm:$0xff]   ;;  %v3612_v56 = vld [vmem:[%s5137_s1 + $0x3ac] ss:$16 sps:$4 sm:$0xff]  }
  0x38   :  { %1300 = vmatprep.subr.bf16.mxu0 %v3514_v57  ;;  %1472 = vmatprep.subr.bf16.mxu1 %v3516_v58  ;;  %v3607_v57 = vld [vmem:[%s5137_s1 + $0x3a0] ss:$16 sps:$4 sm:$0xff]   ;;  %v3610_v58 = vld [vmem:[%s5137_s1 + $0x3a8] ss:$16 sps:$4 sm:$0xff]  }
  0x3b   :  { %1301 = vmatpush1.bf16.msra.mxu0 %v3518_v59  ;;  %1473 = vmatpush1.bf16.msra.mxu1 %v3519_v60  ;;  %v3615_v59 = vld [vmem:[%s5137_s1 + $0x3c4] ss:$16 sps:$4 sm:$0xff]   ;;  %v3618_v60 = vld [vmem:[%s5137_s1 + $0x3cc] ss:$16 sps:$4 sm:$0xff]  }
  0x3c   :  { %1302 = vmatprep.subr.bf16.mxu0 %v3520_v61  ;;  %1474 = vmatprep.subr.bf16.mxu1 %v3522_v62  ;;  %v3613_v61 = vld [vmem:[%s5137_s1 + $0x3c0] ss:$16 sps:$4 sm:$0xff]   ;;  %v3616_v62 = vld [vmem:[%s5137_s1 + $0x3c8] ss:$16 sps:$4 sm:$0xff]  }
  0x3f   :  { %1303 = vmatpush1.bf16.msra.mxu0 %v3524_v63  ;;  %1475 = vmatpush1.bf16.msra.mxu1 %v3525_v0  ;;  %v3621_v63 = vld [vmem:[%s5137_s1 + $0x3e4] ss:$16 sps:$4 sm:$0xff]   ;;  %v3624_v0 = vld [vmem:[%s5137_s1 + $0x3ec] ss:$16 sps:$4 sm:$0xff]  }
  0x40   :  { %1315 = vmatprep.subr.bf16.mxu0 %v3531_v1  ;;  %1487 = vmatprep.subr.bf16.mxu1 %v3534_v2  ;;  %v3619_v1 = vld [vmem:[%s5137_s1 + $0x3e0] ss:$16 sps:$4 sm:$0xff]   ;;  %v3622_v2 = vld [vmem:[%s5137_s1 + $0x3e8] ss:$16 sps:$4 sm:$0xff]  }
  0x42   :  { %1305 = vmatmul.mubr.bf16.vlgmr.msra.gmra.mrb[0].mxu0 %v3526_v3  ;;  %1477 = vmatmul.mubr.bf16.vlgmr.msra.gmra.mrb[0].mxu1 %v3526_v3  ;;  %v3630_v3 = vld [vmem:[%s5137_s1 + $0x404] ss:$16 sps:$4 sm:$0xff]  }
  0x43   :  { %1316 = vmatpush1.bf16.msra.mxu0 %v3529_v4  ;;  %1488 = vmatpush1.bf16.msra.mxu1 %v3532_v5  ;;  %v3633_v4 = vld [vmem:[%s5137_s1 + $0x40c] ss:$16 sps:$4 sm:$0xff]   ;;  %v3625_v5 = vld [vmem:[%s5138_s0 + $0x8] ss:$28 sps:$4 sm:$0xff]  }
  0x44   :  { %1317 = vmatprep.subr.bf16.mxu0 %v3537_v6  ;;  %1489 = vmatprep.subr.bf16.mxu1 %v3540_v7  ;;  %v3628_v6 = vld [vmem:[%s5137_s1 + $0x400] ss:$16 sps:$4 sm:$0xff]   ;;  %v3631_v7 = vld [vmem:[%s5137_s1 + $0x408] ss:$16 sps:$4 sm:$0xff]  }
  0x45   :  { %1347 = vmatprep.mubr.bf16.mxu0 %v3627_v30  ;;  %1519 = vmatprep.mubr.bf16.mxu1 %v3627_v30  ;;  %v3669_v30 = vld [vmem:[%s5137_s1 + $0x4cc] ss:$16 sps:$4 sm:$0xff]  }
  0x47   :  { %1318 = vmatpush1.bf16.msra.mxu0 %v3535_v8  ;;  %1490 = vmatpush1.bf16.msra.mxu1 %v3538_v9  ;;  %v3636_v8 = vld [vmem:[%s5137_s1 + $0x424] ss:$16 sps:$4 sm:$0xff]   ;;  %v3639_v9 = vld [vmem:[%s5137_s1 + $0x42c] ss:$16 sps:$4 sm:$0xff]  }
  0x48   :  { %1319 = vmatprep.subr.bf16.mxu0 %v3543_v10  ;;  %1491 = vmatprep.subr.bf16.mxu1 %v3546_v11  ;;  %v3634_v10 = vld [vmem:[%s5137_s1 + $0x420] ss:$16 sps:$4 sm:$0xff]   ;;  %v3637_v11 = vld [vmem:[%s5137_s1 + $0x428] ss:$16 sps:$4 sm:$0xff]  }
  0x4b   :  { %1320 = vmatpush1.bf16.msra.mxu0 %v3541_v12  ;;  %1492 = vmatpush1.bf16.msra.mxu1 %v3544_v13  ;;  %v3726_v12 = vld [vmem:[%s5138_s0 + $0x14] ss:$28 sps:$4 sm:$0xff]  }
  0x4c   :  { %1321 = vmatprep.subr.bf16.mxu0 %v3549_v14  ;;  %1493 = vmatprep.subr.bf16.mxu1 %v3552_v15  ;;  %v3642_v13 = vld [vmem:[%s5137_s1 + $0x444] ss:$16 sps:$4 sm:$0xff]   ;;  %v3645_v14 = vld [vmem:[%s5137_s1 + $0x44c] ss:$16 sps:$4 sm:$0xff]   ;;  %v3640_v15 = vld [vmem:[%s5137_s1 + $0x440] ss:$16 sps:$4 sm:$0xff]  }
  0x4f   :  { %1322 = vmatpush1.bf16.msra.mxu0 %v3547_v16  ;;  %1494 = vmatpush1.bf16.msra.mxu1 %v3550_v17  ;;  %v3643_v16 = vld [vmem:[%s5137_s1 + $0x448] ss:$16 sps:$4 sm:$0xff]   ;;  %v3648_v17 = vld [vmem:[%s5137_s1 + $0x464] ss:$16 sps:$4 sm:$0xff]  }
  0x50   :  { %1323 = vmatprep.subr.bf16.mxu0 %v3555_v18  ;;  %1495 = vmatprep.subr.bf16.mxu1 %v3558_v19  ;;  %v3651_v18 = vld [vmem:[%s5137_s1 + $0x46c] ss:$16 sps:$4 sm:$0xff]   ;;  %v3646_v19 = vld [vmem:[%s5137_s1 + $0x460] ss:$16 sps:$4 sm:$0xff]  }
  0x53   :  { %1324 = vmatpush1.bf16.msra.mxu0 %v3553_v20  ;;  %1496 = vmatpush1.bf16.msra.mxu1 %v3556_v21  ;;  %v3649_v20 = vld [vmem:[%s5137_s1 + $0x468] ss:$16 sps:$4 sm:$0xff]   ;;  %v3654_v21 = vld [vmem:[%s5137_s1 + $0x484] ss:$16 sps:$4 sm:$0xff]  }
  0x54   :  { %1325 = vmatprep.subr.bf16.mxu0 %v3561_v22  ;;  %1497 = vmatprep.subr.bf16.mxu1 %v3564_v23  ;;  %v3657_v22 = vld [vmem:[%s5137_s1 + $0x48c] ss:$16 sps:$4 sm:$0xff]   ;;  %v3652_v23 = vld [vmem:[%s5137_s1 + $0x480] ss:$16 sps:$4 sm:$0xff]  }
  0x57   :  { %1326 = vmatpush1.bf16.msra.mxu0 %v3559_v24  ;;  %1498 = vmatpush1.bf16.msra.mxu1 %v3562_v25  ;;  %v3655_v24 = vld [vmem:[%s5137_s1 + $0x488] ss:$16 sps:$4 sm:$0xff]   ;;  %v3660_v25 = vld [vmem:[%s5137_s1 + $0x4a4] ss:$16 sps:$4 sm:$0xff]  }
  0x58   :  { %1327 = vmatprep.subr.bf16.mxu0 %v3567_v26  ;;  %1499 = vmatprep.subr.bf16.mxu1 %v3570_v27  ;;  %v3663_v26 = vld [vmem:[%s5137_s1 + $0x4ac] ss:$16 sps:$4 sm:$0xff]   ;;  %v3658_v27 = vld [vmem:[%s5137_s1 + $0x4a0] ss:$16 sps:$4 sm:$0xff]  }
  0x5b   :  { %1328 = vmatpush1.bf16.msra.mxu0 %v3565_v28  ;;  %1500 = vmatpush1.bf16.msra.mxu1 %v3568_v29  ;;  %v3661_v28 = vld [vmem:[%s5137_s1 + $0x4a8] ss:$16 sps:$4 sm:$0xff]   ;;  %v3666_v29 = vld [vmem:[%s5137_s1 + $0x4c4] ss:$16 sps:$4 sm:$0xff]  }
  0x5c   :  { %1329 = vmatprep.subr.bf16.mxu0 %v3573_v31  ;;  %1501 = vmatprep.subr.bf16.mxu1 %v3576_v32  ;;  %v3664_v31 = vld [vmem:[%s5137_s1 + $0x4c0] ss:$16 sps:$4 sm:$0xff]   ;;  %v3667_v32 = vld [vmem:[%s5137_s1 + $0x4c8] ss:$16 sps:$4 sm:$0xff]  }
  0x5f   :  { %1330 = vmatpush1.bf16.msra.mxu0 %v3571_v33  ;;  %1502 = vmatpush1.bf16.msra.mxu1 %v3574_v34  ;;  %v3672_v33 = vld [vmem:[%s5137_s1 + $0x4e4] ss:$16 sps:$4 sm:$0xff]   ;;  %v3675_v34 = vld [vmem:[%s5137_s1 + $0x4ec] ss:$16 sps:$4 sm:$0xff]  }
  0x60   :  { %1331 = vmatprep.subr.bf16.mxu0 %v3579_v35  ;;  %1503 = vmatprep.subr.bf16.mxu1 %v3582_v36  ;;  %v3670_v35 = vld [vmem:[%s5137_s1 + $0x4e0] ss:$16 sps:$4 sm:$0xff]   ;;  %v3673_v36 = vld [vmem:[%s5137_s1 + $0x4e8] ss:$16 sps:$4 sm:$0xff]  }
  0x63   :  { %1332 = vmatpush1.bf16.msra.mxu0 %v3577_v37  ;;  %1504 = vmatpush1.bf16.msra.mxu1 %v3580_v38  ;;  %v3678_v37 = vld [vmem:[%s5137_s1 + $0x504] ss:$16 sps:$4 sm:$0xff]   ;;  %v3681_v38 = vld [vmem:[%s5137_s1 + $0x50c] ss:$16 sps:$4 sm:$0xff]  }
  0x64   :  { %1333 = vmatprep.subr.bf16.mxu0 %v3585_v39  ;;  %1505 = vmatprep.subr.bf16.mxu1 %v3588_v40  ;;  %v3676_v39 = vld [vmem:[%s5137_s1 + $0x500] ss:$16 sps:$4 sm:$0xff]   ;;  %v3679_v40 = vld [vmem:[%s5137_s1 + $0x508] ss:$16 sps:$4 sm:$0xff]  }
  0x67   :  { %1334 = vmatpush1.bf16.msra.mxu0 %v3583_v41  ;;  %1506 = vmatpush1.bf16.msra.mxu1 %v3586_v42  ;;  %v3684_v41 = vld [vmem:[%s5137_s1 + $0x524] ss:$16 sps:$4 sm:$0xff]   ;;  %v3687_v42 = vld [vmem:[%s5137_s1 + $0x52c] ss:$16 sps:$4 sm:$0xff]  }
  0x68   :  { %1335 = vmatprep.subr.bf16.mxu0 %v3591_v43  ;;  %1507 = vmatprep.subr.bf16.mxu1 %v3594_v44  ;;  %v3682_v43 = vld [vmem:[%s5137_s1 + $0x520] ss:$16 sps:$4 sm:$0xff]   ;;  %v3685_v44 = vld [vmem:[%s5137_s1 + $0x528] ss:$16 sps:$4 sm:$0xff]  }
  0x6b   :  { %1336 = vmatpush1.bf16.msra.mxu0 %v3589_v45  ;;  %1508 = vmatpush1.bf16.msra.mxu1 %v3592_v46  ;;  %v3690_v45 = vld [vmem:[%s5137_s1 + $0x544] ss:$16 sps:$4 sm:$0xff]   ;;  %v3693_v46 = vld [vmem:[%s5137_s1 + $0x54c] ss:$16 sps:$4 sm:$0xff]  }
  0x6c   :  { %1337 = vmatprep.subr.bf16.mxu0 %v3597_v47  ;;  %1509 = vmatprep.subr.bf16.mxu1 %v3600_v48  ;;  %v3688_v47 = vld [vmem:[%s5137_s1 + $0x540] ss:$16 sps:$4 sm:$0xff]   ;;  %v3691_v48 = vld [vmem:[%s5137_s1 + $0x548] ss:$16 sps:$4 sm:$0xff]  }
  0x6f   :  { %1338 = vmatpush1.bf16.msra.mxu0 %v3595_v49  ;;  %1510 = vmatpush1.bf16.msra.mxu1 %v3598_v50  ;;  %v3696_v49 = vld [vmem:[%s5137_s1 + $0x564] ss:$16 sps:$4 sm:$0xff]   ;;  %v3699_v50 = vld [vmem:[%s5137_s1 + $0x56c] ss:$16 sps:$4 sm:$0xff]  }
  0x70   :  { %1339 = vmatprep.subr.bf16.mxu0 %v3603_v51  ;;  %1511 = vmatprep.subr.bf16.mxu1 %v3606_v52  ;;  %v3694_v51 = vld [vmem:[%s5137_s1 + $0x560] ss:$16 sps:$4 sm:$0xff]   ;;  %v3697_v52 = vld [vmem:[%s5137_s1 + $0x568] ss:$16 sps:$4 sm:$0xff]  }
  0x73   :  { %1340 = vmatpush1.bf16.msra.mxu0 %v3601_v53  ;;  %1512 = vmatpush1.bf16.msra.mxu1 %v3604_v54  ;;  %v3702_v53 = vld [vmem:[%s5137_s1 + $0x584] ss:$16 sps:$4 sm:$0xff]   ;;  %v3705_v54 = vld [vmem:[%s5137_s1 + $0x58c] ss:$16 sps:$4 sm:$0xff]  }
  0x74   :  { %1341 = vmatprep.subr.bf16.mxu0 %v3609_v55  ;;  %1513 = vmatprep.subr.bf16.mxu1 %v3612_v56  ;;  %v3700_v55 = vld [vmem:[%s5137_s1 + $0x580] ss:$16 sps:$4 sm:$0xff]   ;;  %v3703_v56 = vld [vmem:[%s5137_s1 + $0x588] ss:$16 sps:$4 sm:$0xff]  }
  0x77   :  { %1342 = vmatpush1.bf16.msra.mxu0 %v3607_v57  ;;  %1514 = vmatpush1.bf16.msra.mxu1 %v3610_v58  ;;  %v3708_v57 = vld [vmem:[%s5137_s1 + $0x5a4] ss:$16 sps:$4 sm:$0xff]   ;;  %v3711_v58 = vld [vmem:[%s5137_s1 + $0x5ac] ss:$16 sps:$4 sm:$0xff]  }
  0x78   :  { %1343 = vmatprep.subr.bf16.mxu0 %v3615_v59  ;;  %1515 = vmatprep.subr.bf16.mxu1 %v3618_v60  ;;  %v3706_v59 = vld [vmem:[%s5137_s1 + $0x5a0] ss:$16 sps:$4 sm:$0xff]   ;;  %v3709_v60 = vld [vmem:[%s5137_s1 + $0x5a8] ss:$16 sps:$4 sm:$0xff]  }
  0x7b   :  { %1344 = vmatpush1.bf16.msra.mxu0 %v3613_v61  ;;  %1516 = vmatpush1.bf16.msra.mxu1 %v3616_v62  ;;  %v3714_v61 = vld [vmem:[%s5137_s1 + $0x5c4] ss:$16 sps:$4 sm:$0xff]   ;;  %v3717_v62 = vld [vmem:[%s5137_s1 + $0x5cc] ss:$16 sps:$4 sm:$0xff]  }
  0x7c   :  { %1345 = vmatprep.subr.bf16.mxu0 %v3621_v63  ;;  %1517 = vmatprep.subr.bf16.mxu1 %v3624_v0  ;;  %v3712_v63 = vld [vmem:[%s5137_s1 + $0x5c0] ss:$16 sps:$4 sm:$0xff]   ;;  %v3715_v0 = vld [vmem:[%s5137_s1 + $0x5c8] ss:$16 sps:$4 sm:$0xff]  }
  0x7f   :  { %1346 = vmatpush1.bf16.msra.mxu0 %v3619_v1  ;;  %1518 = vmatpush1.bf16.msra.mxu1 %v3622_v2  ;;  %v3720_v1 = vld [vmem:[%s5137_s1 + $0x5e4] ss:$16 sps:$4 sm:$0xff]   ;;  %v3723_v2 = vld [vmem:[%s5137_s1 + $0x5ec] ss:$16 sps:$4 sm:$0xff]  }
  0x80   :  { %1358 = vmatprep.subr.bf16.mxu0 %v3630_v3  ;;  %1530 = vmatprep.subr.bf16.mxu1 %v3633_v4  ;;  %v3718_v3 = vld [vmem:[%s5137_s1 + $0x5e0] ss:$16 sps:$4 sm:$0xff]   ;;  %v3721_v4 = vld [vmem:[%s5137_s1 + $0x5e8] ss:$16 sps:$4 sm:$0xff]  }
  0x82   :  { %1348 = vmatmul.mubr.bf16.vlgmr.msra.gmra.mrb[0].mxu0 %v3625_v5  ;;  %1520 = vmatmul.mubr.bf16.vlgmr.msra.gmra.mrb[0].mxu1 %v3625_v5  ;;  %v3729_v5 = vld [vmem:[%s5137_s1 + $0x604] ss:$16 sps:$4 sm:$0xff]  }
  0x83   :  { %1359 = vmatpush1.bf16.msra.mxu0 %v3628_v6  ;;  %1531 = vmatpush1.bf16.msra.mxu1 %v3631_v7  ;;  %v3732_v6 = vld [vmem:[%s5137_s1 + $0x60c] ss:$16 sps:$4 sm:$0xff]  }
  0x84   :  { %1360 = vmatprep.subr.bf16.mxu0 %v3636_v8  ;;  %1532 = vmatprep.subr.bf16.mxu1 %v3639_v9  ;;  %v3724_v7 = vld [vmem:[%s5138_s0 + $0x10] ss:$28 sps:$4 sm:$0xff]   ;;  %v3730_v9 = vld [vmem:[%s5137_s1 + $0x608] ss:$16 sps:$4 sm:$0xff]  }
  0x85   :  { %1390 = vmatprep.mubr.bf16.mxu0 %v3726_v12  ;;  %1562 = vmatprep.mubr.bf16.mxu1 %v3726_v12  ;;  %v3727_v8 = vld [vmem:[%s5137_s1 + $0x600] ss:$16 sps:$4 sm:$0xff]   ;;  %v3966_v12 = vmov 0  }
  0x87   :  { %1361 = vmatpush1.bf16.msra.mxu0 %v3634_v10  ;;  %1533 = vmatpush1.bf16.msra.mxu1 %v3637_v11  ;;  %v3736_v10 = vld [vmem:[%s5139_s3 + $0x4] ss:$16 sps:$4 sm:$0xff]   ;;  %v3739_v11 = vld [vmem:[%s5139_s3 + $0xc] ss:$16 sps:$4 sm:$0xff]  }
  0x88   :  { %1362 = vmatprep.subr.bf16.mxu0 %v3642_v13  ;;  %1534 = vmatprep.subr.bf16.mxu1 %v3645_v14  ;;  %v3733_v13 = vld [vmem:[%s5138_s0 + $0x18] ss:$28 sps:$4 sm:$0xff]   ;;  %v3734_v14 = vld [vmem:[%s5139_s3] ss:$16 sps:$4 sm:$0xff]  }
  0x8b   :  { %1363 = vmatpush1.bf16.msra.mxu0 %v3640_v15  ;;  %1535 = vmatpush1.bf16.msra.mxu1 %v3643_v16  ;;  %v3737_v15 = vld [vmem:[%s5139_s3 + $0x8] ss:$16 sps:$4 sm:$0xff]   ;;  %v3742_v16 = vld [vmem:[%s5139_s3 + $0x24] ss:$16 sps:$4 sm:$0xff]  }
  0x8c   :  { %1364 = vmatprep.subr.bf16.mxu0 %v3648_v17  ;;  %1536 = vmatprep.subr.bf16.mxu1 %v3651_v18  ;;  %v3745_v17 = vld [vmem:[%s5139_s3 + $0x2c] ss:$16 sps:$4 sm:$0xff]   ;;  %v3740_v18 = vld [vmem:[%s5139_s3 + $0x20] ss:$16 sps:$4 sm:$0xff]  }
  0x8f   :  { %1365 = vmatpush1.bf16.msra.mxu0 %v3646_v19  ;;  %1537 = vmatpush1.bf16.msra.mxu1 %v3649_v20  ;;  %v3743_v19 = vld [vmem:[%s5139_s3 + $0x28] ss:$16 sps:$4 sm:$0xff]   ;;  %v3748_v20 = vld [vmem:[%s5139_s3 + $0x44] ss:$16 sps:$4 sm:$0xff]  }
  0x90   :  { %1366 = vmatprep.subr.bf16.mxu0 %v3654_v21  ;;  %1538 = vmatprep.subr.bf16.mxu1 %v3657_v22  ;;  %v3751_v21 = vld [vmem:[%s5139_s3 + $0x4c] ss:$16 sps:$4 sm:$0xff]   ;;  %v3746_v22 = vld [vmem:[%s5139_s3 + $0x40] ss:$16 sps:$4 sm:$0xff]  }
  0x93   :  { %1367 = vmatpush1.bf16.msra.mxu0 %v3652_v23  ;;  %1539 = vmatpush1.bf16.msra.mxu1 %v3655_v24  ;;  %v3749_v23 = vld [vmem:[%s5139_s3 + $0x48] ss:$16 sps:$4 sm:$0xff]   ;;  %v3754_v24 = vld [vmem:[%s5139_s3 + $0x64] ss:$16 sps:$4 sm:$0xff]  }
  0x94   :  { %1368 = vmatprep.subr.bf16.mxu0 %v3660_v25  ;;  %1540 = vmatprep.subr.bf16.mxu1 %v3663_v26  ;;  %v3757_v25 = vld [vmem:[%s5139_s3 + $0x6c] ss:$16 sps:$4 sm:$0xff]   ;;  %v3752_v26 = vld [vmem:[%s5139_s3 + $0x60] ss:$16 sps:$4 sm:$0xff]  }
  0x97   :  { %1369 = vmatpush1.bf16.msra.mxu0 %v3658_v27  ;;  %1541 = vmatpush1.bf16.msra.mxu1 %v3661_v28  ;;  %v3755_v27 = vld [vmem:[%s5139_s3 + $0x68] ss:$16 sps:$4 sm:$0xff]   ;;  %v3760_v28 = vld [vmem:[%s5139_s3 + $0x84] ss:$16 sps:$4 sm:$0xff]  }
  0x98   :  { %1370 = vmatprep.subr.bf16.mxu0 %v3666_v29  ;;  %1542 = vmatprep.subr.bf16.mxu1 %v3669_v30  ;;  %v3763_v29 = vld [vmem:[%s5139_s3 + $0x8c] ss:$16 sps:$4 sm:$0xff]   ;;  %v3758_v30 = vld [vmem:[%s5139_s3 + $0x80] ss:$16 sps:$4 sm:$0xff]  }
  0x9b   :  { %1371 = vmatpush1.bf16.msra.mxu0 %v3664_v31  ;;  %1543 = vmatpush1.bf16.msra.mxu1 %v3667_v32  ;;  %v3761_v31 = vld [vmem:[%s5139_s3 + $0x88] ss:$16 sps:$4 sm:$0xff]   ;;  %v3766_v32 = vld [vmem:[%s5139_s3 + $0xa4] ss:$16 sps:$4 sm:$0xff]  }
  0x9c   :  { %1372 = vmatprep.subr.bf16.mxu0 %v3672_v33  ;;  %1544 = vmatprep.subr.bf16.mxu1 %v3675_v34  ;;  %v3769_v33 = vld [vmem:[%s5139_s3 + $0xac] ss:$16 sps:$4 sm:$0xff]   ;;  %v3764_v34 = vld [vmem:[%s5139_s3 + $0xa0] ss:$16 sps:$4 sm:$0xff]  }
  0x9f   :  { %1373 = vmatpush1.bf16.msra.mxu0 %v3670_v35  ;;  %1545 = vmatpush1.bf16.msra.mxu1 %v3673_v36  ;;  %v3767_v35 = vld [vmem:[%s5139_s3 + $0xa8] ss:$16 sps:$4 sm:$0xff]   ;;  %v3772_v36 = vld [vmem:[%s5139_s3 + $0xc4] ss:$16 sps:$4 sm:$0xff]  }
  0xa0   :  { %1374 = vmatprep.subr.bf16.mxu0 %v3678_v37  ;;  %1546 = vmatprep.subr.bf16.mxu1 %v3681_v38  ;;  %v3775_v37 = vld [vmem:[%s5139_s3 + $0xcc] ss:$16 sps:$4 sm:$0xff]   ;;  %v3770_v38 = vld [vmem:[%s5139_s3 + $0xc0] ss:$16 sps:$4 sm:$0xff]  }
  0xa3   :  { %1375 = vmatpush1.bf16.msra.mxu0 %v3676_v39  ;;  %1547 = vmatpush1.bf16.msra.mxu1 %v3679_v40  ;;  %v3773_v39 = vld [vmem:[%s5139_s3 + $0xc8] ss:$16 sps:$4 sm:$0xff]   ;;  %v3778_v40 = vld [vmem:[%s5139_s3 + $0xe4] ss:$16 sps:$4 sm:$0xff]  }
  0xa4   :  { %1376 = vmatprep.subr.bf16.mxu0 %v3684_v41  ;;  %1548 = vmatprep.subr.bf16.mxu1 %v3687_v42  ;;  %v3781_v41 = vld [vmem:[%s5139_s3 + $0xec] ss:$16 sps:$4 sm:$0xff]   ;;  %v3776_v42 = vld [vmem:[%s5139_s3 + $0xe0] ss:$16 sps:$4 sm:$0xff]  }
  0xa7   :  { %1377 = vmatpush1.bf16.msra.mxu0 %v3682_v43  ;;  %1549 = vmatpush1.bf16.msra.mxu1 %v3685_v44  ;;  %v3779_v43 = vld [vmem:[%s5139_s3 + $0xe8] ss:$16 sps:$4 sm:$0xff]   ;;  %v3784_v44 = vld [vmem:[%s5139_s3 + $0x104] ss:$16 sps:$4 sm:$0xff]  }
  0xa8   :  { %1378 = vmatprep.subr.bf16.mxu0 %v3690_v45  ;;  %1550 = vmatprep.subr.bf16.mxu1 %v3693_v46  ;;  %v3787_v45 = vld [vmem:[%s5139_s3 + $0x10c] ss:$16 sps:$4 sm:$0xff]   ;;  %v3782_v46 = vld [vmem:[%s5139_s3 + $0x100] ss:$16 sps:$4 sm:$0xff]  }
  0xab   :  { %1379 = vmatpush1.bf16.msra.mxu0 %v3688_v47  ;;  %1551 = vmatpush1.bf16.msra.mxu1 %v3691_v48  ;;  %v3785_v47 = vld [vmem:[%s5139_s3 + $0x108] ss:$16 sps:$4 sm:$0xff]   ;;  %v3790_v48 = vld [vmem:[%s5139_s3 + $0x124] ss:$16 sps:$4 sm:$0xff]  }
  0xac   :  { %1380 = vmatprep.subr.bf16.mxu0 %v3696_v49  ;;  %1552 = vmatprep.subr.bf16.mxu1 %v3699_v50  ;;  %v3793_v49 = vld [vmem:[%s5139_s3 + $0x12c] ss:$16 sps:$4 sm:$0xff]   ;;  %v3788_v50 = vld [vmem:[%s5139_s3 + $0x120] ss:$16 sps:$4 sm:$0xff]  }
  0xaf   :  { %1381 = vmatpush1.bf16.msra.mxu0 %v3694_v51  ;;  %1553 = vmatpush1.bf16.msra.mxu1 %v3697_v52  ;;  %v3791_v51 = vld [vmem:[%s5139_s3 + $0x128] ss:$16 sps:$4 sm:$0xff]   ;;  %v3796_v52 = vld [vmem:[%s5139_s3 + $0x144] ss:$16 sps:$4 sm:$0xff]  }
  0xb0   :  { %1382 = vmatprep.subr.bf16.mxu0 %v3702_v53  ;;  %1554 = vmatprep.subr.bf16.mxu1 %v3705_v54  ;;  %v3799_v53 = vld [vmem:[%s5139_s3 + $0x14c] ss:$16 sps:$4 sm:$0xff]   ;;  %v3794_v54 = vld [vmem:[%s5139_s3 + $0x140] ss:$16 sps:$4 sm:$0xff]  }
  0xb3   :  { %1383 = vmatpush1.bf16.msra.mxu0 %v3700_v55  ;;  %1555 = vmatpush1.bf16.msra.mxu1 %v3703_v56  ;;  %v3797_v55 = vld [vmem:[%s5139_s3 + $0x148] ss:$16 sps:$4 sm:$0xff]   ;;  %v3802_v56 = vld [vmem:[%s5139_s3 + $0x164] ss:$16 sps:$4 sm:$0xff]  }
  0xb4   :  { %1384 = vmatprep.subr.bf16.mxu0 %v3708_v57  ;;  %1556 = vmatprep.subr.bf16.mxu1 %v3711_v58  ;;  %v3805_v57 = vld [vmem:[%s5139_s3 + $0x16c] ss:$16 sps:$4 sm:$0xff]   ;;  %v3800_v58 = vld [vmem:[%s5139_s3 + $0x160] ss:$16 sps:$4 sm:$0xff]  }
  0xb7   :  { %1385 = vmatpush1.bf16.msra.mxu0 %v3706_v59  ;;  %1557 = vmatpush1.bf16.msra.mxu1 %v3709_v60  ;;  %v3803_v59 = vld [vmem:[%s5139_s3 + $0x168] ss:$16 sps:$4 sm:$0xff]   ;;  %v3808_v60 = vld [vmem:[%s5139_s3 + $0x184] ss:$16 sps:$4 sm:$0xff]  }
  0xb8   :  { %1386 = vmatprep.subr.bf16.mxu0 %v3714_v61  ;;  %1558 = vmatprep.subr.bf16.mxu1 %v3717_v62  ;;  %v3811_v61 = vld [vmem:[%s5139_s3 + $0x18c] ss:$16 sps:$4 sm:$0xff]   ;;  %v3806_v62 = vld [vmem:[%s5139_s3 + $0x180] ss:$16 sps:$4 sm:$0xff]  }
  0xbb   :  { %1387 = vmatpush1.bf16.msra.mxu0 %v3712_v63  ;;  %1559 = vmatpush1.bf16.msra.mxu1 %v3715_v0  ;;  %v3809_v63 = vld [vmem:[%s5139_s3 + $0x188] ss:$16 sps:$4 sm:$0xff]   ;;  %v3814_v0 = vld [vmem:[%s5139_s3 + $0x1a4] ss:$16 sps:$4 sm:$0xff]  }
  0xbc   :  { %1388 = vmatprep.subr.bf16.mxu0 %v3720_v1  ;;  %1560 = vmatprep.subr.bf16.mxu1 %v3723_v2  ;;  %v3817_v1 = vld [vmem:[%s5139_s3 + $0x1ac] ss:$16 sps:$4 sm:$0xff]   ;;  %v3812_v2 = vld [vmem:[%s5139_s3 + $0x1a0] ss:$16 sps:$4 sm:$0xff]  }
  0xbf   :  { %1389 = vmatpush1.bf16.msra.mxu0 %v3718_v3  ;;  %1561 = vmatpush1.bf16.msra.mxu1 %v3721_v4  ;;  %v3815_v3 = vld [vmem:[%s5139_s3 + $0x1a8] ss:$16 sps:$4 sm:$0xff]   ;;  %v3820_v4 = vld [vmem:[%s5139_s3 + $0x1c4] ss:$16 sps:$4 sm:$0xff]  }
  0xc0   :  { %1401 = vmatprep.subr.bf16.mxu0 %v3729_v5  ;;  %1573 = vmatprep.subr.bf16.mxu1 %v3732_v6  ;;  %v3823_v5 = vld [vmem:[%s5139_s3 + $0x1cc] ss:$16 sps:$4 sm:$0xff]   ;;  %v3818_v6 = vld [vmem:[%s5139_s3 + $0x1c0] ss:$16 sps:$4 sm:$0xff]  }
  0xc2   :  { %1391 = vmatmul.mubr.bf16.vlgmr.msra.gmra.mrb[0].mxu0 %v3724_v7  ;;  %1563 = vmatmul.mubr.bf16.vlgmr.msra.gmra.mrb[0].mxu1 %v3724_v7  ;;  %v3821_v7 = vld [vmem:[%s5139_s3 + $0x1c8] ss:$16 sps:$4 sm:$0xff]  }
  0xc3   :  { %1402 = vmatpush1.bf16.msra.mxu0 %v3727_v8  ;;  %1574 = vmatpush1.bf16.msra.mxu1 %v3730_v9  ;;  %v3826_v8 = vld [vmem:[%s5139_s3 + $0x1e4] ss:$16 sps:$4 sm:$0xff]   ;;  %v3829_v9 = vld [vmem:[%s5139_s3 + $0x1ec] ss:$16 sps:$4 sm:$0xff]  }
  0xc4   :  { %1433 = vmatprep.mubr.bf16.mxu0 %v3966_v12  ;;  %1605 = vmatprep.mubr.bf16.mxu1 %v3966_v12  ;;  %v3832_v12 = vld [vmem:[%s5139_s3 + $0x204] ss:$16 sps:$4 sm:$0xff]  }
  0xc5   :  { %2418 = vmatprep.subr.bf16.mxu0 %v3736_v10  ;;  %2504 = vmatprep.subr.bf16.mxu1 %v3739_v11  ;;  %v3824_v10 = vld [vmem:[%s5139_s3 + $0x1e0] ss:$16 sps:$4 sm:$0xff]   ;;  %v3827_v11 = vld [vmem:[%s5139_s3 + $0x1e8] ss:$16 sps:$4 sm:$0xff]  }
  0xce   :  { %3174 = vmatmul.mubr.msk.bf16.vlgmr.msra.gmra.mrb[0].mxu0 %vm1268_vm0, %v3733_v13  ;;  %3175 = vmatmul.mubr.msk.bf16.vlgmr.msra.gmra.mrb[0].mxu1 %vm1268_vm0, %v3733_v13  ;;  %v3835_v13 = vld [vmem:[%s5139_s3 + $0x20c] ss:$16 sps:$4 sm:$0xff]  }
  0xcf   :  { %2419 = vmatpush1.bf16.msra.mxu0 %v3734_v14  ;;  %2505 = vmatpush1.bf16.msra.mxu1 %v3737_v15  ;;  %v233_v14 = vlaneseq }
  0xd0   :  { %2420 = vmatprep.subr.bf16.mxu0 %v3742_v16  ;;  %2506 = vmatprep.subr.bf16.mxu1 %v3745_v17 }
  0xd1   :  { %v4814_v15 = vshrl.u32 %v233_v14, 7  ;;  %v3869_v14 = vld [vmem:[%s5139_s3 + $0x2c8] ss:$16 sps:$4 sm:$0xff]  }
  0xd3   :  { %2421 = vmatpush1.bf16.msra.mxu0 %v3740_v18  ;;  %2507 = vmatpush1.bf16.msra.mxu1 %v3743_v19  ;;  %v235_v16 = vsub.s32 0, %v4814_v15  ;;  %v243_v17 = vsub.s32 2, %v4814_v15  ;;  %v231_v18 = vld [vmem:[%s5141_s2] sm:$0xf]  ;;  %v239_v19 = vsub.s32 1, %v4814_v15 }
  0xd4   :  { %2422 = vmatprep.subr.bf16.mxu0 %v3748_v20  ;;  %2508 = vmatprep.subr.bf16.mxu1 %v3751_v21  ;;  %v247_v20 = vsub.s32 3, %v4814_v15 }
  0xd5   :  { %v236_v21 = vrot.slane %v231_v18, %v235_v16 }
  0xd7   :  { %2423 = vmatpush1.bf16.msra.mxu0 %v3746_v22  ;;  %2509 = vmatpush1.bf16.msra.mxu1 %v3749_v23  ;;  %v244_v22 = vrot.slane %v231_v18, %v243_v17  ;;  %v240_v23 = vrot.slane %v231_v18, %v239_v19 }
  0xd8   :  { %2424 = vmatprep.subr.bf16.mxu0 %v3754_v24  ;;  %2510 = vmatprep.subr.bf16.mxu1 %v3757_v25  ;;  %v248_v24 = vrot.slane %v231_v18, %v247_v20  ;;  %v3874_v18 = vld [vmem:[%s5139_s3 + $0x2e4] ss:$16 sps:$4 sm:$0xff]  }
  0xdb   :  { %2425 = vmatpush1.bf16.msra.mxu0 %v3752_v26  ;;  %2511 = vmatpush1.bf16.msra.mxu1 %v3755_v27 }
  0xdc   :  { %2426 = vmatprep.subr.bf16.mxu0 %v3760_v28  ;;  %2512 = vmatprep.subr.bf16.mxu1 %v3763_v29 }
  0xdf   :  { %2427 = vmatpush1.bf16.msra.mxu0 %v3758_v30  ;;  %2513 = vmatpush1.bf16.msra.mxu1 %v3761_v31 }
  0xe0   :  { %2428 = vmatprep.subr.bf16.mxu0 %v3766_v32  ;;  %2514 = vmatprep.subr.bf16.mxu1 %v3769_v33 }
  0xe3   :  { %2429 = vmatpush1.bf16.msra.mxu0 %v3764_v34  ;;  %2515 = vmatpush1.bf16.msra.mxu1 %v3767_v35 }
  0xe4   :  { %2430 = vmatprep.subr.bf16.mxu0 %v3772_v36  ;;  %2516 = vmatprep.subr.bf16.mxu1 %v3775_v37 }
  0xe7   :  { %2431 = vmatpush1.bf16.msra.mxu0 %v3770_v38  ;;  %2517 = vmatpush1.bf16.msra.mxu1 %v3773_v39 }
  0xe8   :  { %2432 = vmatprep.subr.bf16.mxu0 %v3778_v40  ;;  %2518 = vmatprep.subr.bf16.mxu1 %v3781_v41 }
  0xeb   :  { %2433 = vmatpush1.bf16.msra.mxu0 %v3776_v42  ;;  %2519 = vmatpush1.bf16.msra.mxu1 %v3779_v43 }
  0xec   :  { %2434 = vmatprep.subr.bf16.mxu0 %v3784_v44  ;;  %2520 = vmatprep.subr.bf16.mxu1 %v3787_v45 }
  0xef   :  { %2435 = vmatpush1.bf16.msra.mxu0 %v3782_v46  ;;  %2521 = vmatpush1.bf16.msra.mxu1 %v3785_v47 }
  0xf0   :  { %2436 = vmatprep.subr.bf16.mxu0 %v3790_v48  ;;  %2522 = vmatprep.subr.bf16.mxu1 %v3793_v49 }
  0xf3   :  { %2437 = vmatpush1.bf16.msra.mxu0 %v3788_v50  ;;  %2523 = vmatpush1.bf16.msra.mxu1 %v3791_v51 }
  0xf4   :  { %2438 = vmatprep.subr.bf16.mxu0 %v3796_v52  ;;  %2524 = vmatprep.subr.bf16.mxu1 %v3799_v53  ;;  %v3830_v53 = vld [vmem:[%s5139_s3 + $0x200] ss:$16 sps:$4 sm:$0xff]  }
  0xf7   :  { %2439 = vmatpush1.bf16.msra.mxu0 %v3794_v54  ;;  %2525 = vmatpush1.bf16.msra.mxu1 %v3797_v55  ;;  %v3833_v54 = vld [vmem:[%s5139_s3 + $0x208] ss:$16 sps:$4 sm:$0xff]   ;;  %v3838_v55 = vld [vmem:[%s5139_s3 + $0x224] ss:$16 sps:$4 sm:$0xff]  }
  0xf8   :  { %2440 = vmatprep.subr.bf16.mxu0 %v3802_v56  ;;  %2526 = vmatprep.subr.bf16.mxu1 %v3805_v57  ;;  %v3841_v56 = vld [vmem:[%s5139_s3 + $0x22c] ss:$16 sps:$4 sm:$0xff]   ;;  %v3836_v57 = vld [vmem:[%s5139_s3 + $0x220] ss:$16 sps:$4 sm:$0xff]  }
  0xfb   :  { %2441 = vmatpush1.bf16.msra.mxu0 %v3800_v58  ;;  %2527 = vmatpush1.bf16.msra.mxu1 %v3803_v59  ;;  %v3839_v58 = vld [vmem:[%s5139_s3 + $0x228] ss:$16 sps:$4 sm:$0xff]   ;;  %v3844_v59 = vld [vmem:[%s5139_s3 + $0x244] ss:$16 sps:$4 sm:$0xff]  }
  0xfc   :  { %2442 = vmatprep.subr.bf16.mxu0 %v3808_v60  ;;  %2528 = vmatprep.subr.bf16.mxu1 %v3811_v61  ;;  %v3847_v60 = vld [vmem:[%s5139_s3 + $0x24c] ss:$16 sps:$4 sm:$0xff]   ;;  %v3842_v61 = vld [vmem:[%s5139_s3 + $0x240] ss:$16 sps:$4 sm:$0xff]  }
  0xff   :  { %2443 = vmatpush1.bf16.msra.mxu0 %v3806_v62  ;;  %2529 = vmatpush1.bf16.msra.mxu1 %v3809_v63  ;;  %v3845_v62 = vld [vmem:[%s5139_s3 + $0x248] ss:$16 sps:$4 sm:$0xff]   ;;  %v3850_v63 = vld [vmem:[%s5139_s3 + $0x264] ss:$16 sps:$4 sm:$0xff]  }
 0x100   :  { %2444 = vmatprep.subr.bf16.mxu0 %v3814_v0  ;;  %2530 = vmatprep.subr.bf16.mxu1 %v3817_v1  ;;  %v3853_v0 = vld [vmem:[%s5139_s3 + $0x26c] ss:$16 sps:$4 sm:$0xff]   ;;  %v3848_v1 = vld [vmem:[%s5139_s3 + $0x260] ss:$16 sps:$4 sm:$0xff]  }
 0x103   :  { %2445 = vmatpush1.bf16.msra.mxu0 %v3812_v2  ;;  %2531 = vmatpush1.bf16.msra.mxu1 %v3815_v3  ;;  %v3851_v2 = vld [vmem:[%s5139_s3 + $0x268] ss:$16 sps:$4 sm:$0xff]   ;;  %v3856_v3 = vld [vmem:[%s5139_s3 + $0x284] ss:$16 sps:$4 sm:$0xff]  }
 0x104   :  { %2446 = vmatprep.subr.bf16.mxu0 %v3820_v4  ;;  %2532 = vmatprep.subr.bf16.mxu1 %v3823_v5  ;;  %v3859_v4 = vld [vmem:[%s5139_s3 + $0x28c] ss:$16 sps:$4 sm:$0xff]   ;;  %v3854_v5 = vld [vmem:[%s5139_s3 + $0x280] ss:$16 sps:$4 sm:$0xff]  }
 0x107   :  { %2447 = vmatpush1.bf16.msra.mxu0 %v3818_v6  ;;  %2533 = vmatpush1.bf16.msra.mxu1 %v3821_v7  ;;  %v3857_v6 = vld [vmem:[%s5139_s3 + $0x288] ss:$16 sps:$4 sm:$0xff]   ;;  %v3862_v7 = vld [vmem:[%s5139_s3 + $0x2a4] ss:$16 sps:$4 sm:$0xff]  }
 0x108   :  { %2448 = vmatprep.subr.bf16.mxu0 %v3826_v8  ;;  %2534 = vmatprep.subr.bf16.mxu1 %v3829_v9  ;;  %v3865_v8 = vld [vmem:[%s5139_s3 + $0x2ac] ss:$16 sps:$4 sm:$0xff]   ;;  %v3860_v9 = vld [vmem:[%s5139_s3 + $0x2a0] ss:$16 sps:$4 sm:$0xff]  }
 0x10b   :  { %2449 = vmatpush1.bf16.msra.mxu0 %v3824_v10  ;;  %2535 = vmatpush1.bf16.msra.mxu1 %v3827_v11  ;;  %v3863_v10 = vld [vmem:[%s5139_s3 + $0x2a8] ss:$16 sps:$4 sm:$0xff]   ;;  %v3868_v11 = vld [vmem:[%s5139_s3 + $0x2c4] ss:$16 sps:$4 sm:$0xff]  }
 0x10c   :  { %2461 = vmatprep.subr.bf16.mxu0 %v3832_v12  ;;  %2547 = vmatprep.subr.bf16.mxu1 %v3835_v13  ;;  %v3871_v12 = vld [vmem:[%s5139_s3 + $0x2cc] ss:$16 sps:$4 sm:$0xff]   ;;  %v3866_v13 = vld [vmem:[%s5139_s3 + $0x2c0] ss:$16 sps:$4 sm:$0xff]  }
 0x1a1   :  { %v1435_v25 = vpop.f32.mrb[0].mxu0  ;;  %v1607_v26 = vpop.f32.mrb[0].mxu1 }
 0x1a2   :  { %v3381_v27 = vadd.f32 %v1435_v25, %v236_v21  ;;  %v3385_v28 = vadd.f32 %v1607_v26, %v244_v22  ;;  %v1437_v29 = vpop.f32.mrb[1].mxu0  ;;  %v1609_v30 = vpop.f32.mrb[1].mxu1  ;;  %v3883_v25 = vld [vmem:[%s5139_s3 + $0x30c] ss:$16 sps:$4 sm:$0xff]   ;;  %v3878_v26 = vld [vmem:[%s5139_s3 + $0x300] ss:$16 sps:$4 sm:$0xff]  }
 0x1a3   :  { %v3382_v31 = vadd.f32 %v1437_v29, %v240_v23  ;;  %v3386_v32 = vadd.f32 %v1609_v30, %v248_v24  ;;  %v1439_v33 = vpop.f32.mrb[2].mxu0  ;;  %v1611_v34 = vpop.f32.mrb[2].mxu1  ;;  %v3889_v29 = vld [vmem:[%s5139_s3 + $0x32c] ss:$16 sps:$4 sm:$0xff]   ;;  %v3884_v30 = vld [vmem:[%s5139_s3 + $0x320] ss:$16 sps:$4 sm:$0xff]  }
 0x1a4   :  { %v3383_v35 = vadd.f32 %v1439_v33, %v236_v21  ;;  %v3387_v36 = vadd.f32 %v1611_v34, %v244_v22  ;;  %v1441_v37 = vpop.f32.mrb[3].mxu0  ;;  %v1613_v38 = vpop.f32.mrb[3].mxu1  ;;  %v1616_v41 = vmax.f32 %v3381_v27, 0.0  ;;  %v1618_v42 = vmax.f32 %v3385_v28, 0.0  ;;  %v3877_v21 = vld [vmem:[%s5139_s3 + $0x2ec] ss:$16 sps:$4 sm:$0xff]  }
 0x1a5   :  { %v3384_v39 = vadd.f32 %v1441_v37, %v240_v23  ;;  %v3388_v40 = vadd.f32 %v1613_v38, %v248_v24  ;;  %v1617_v45 = vmax.f32 %v3382_v31, 0.0  ;;  %v1619_v46 = vmax.f32 %v3386_v32, 0.0  ;;  %v3872_v22 = vld [vmem:[%s5139_s3 + $0x2e0] ss:$16 sps:$4 sm:$0xff]   ;;  %v3875_v23 = vld [vmem:[%s5139_s3 + $0x2e8] ss:$16 sps:$4 sm:$0xff]  }
 0x1a6   :  { %v1620_v43 = vmax.f32 %v3383_v35, 0.0  ;;  %v1622_v44 = vmax.f32 %v3387_v36, 0.0  ;;  %v3880_v24 = vld [vmem:[%s5139_s3 + $0x304] ss:$16 sps:$4 sm:$0xff]   ;;  %v3881_v27 = vld [vmem:[%s5139_s3 + $0x308] ss:$16 sps:$4 sm:$0xff]  }
 0x1a7   :  { %v1621_v47 = vmax.f32 %v3384_v39, 0.0  ;;  %v1623_v48 = vmax.f32 %v3388_v40, 0.0  ;;  %v3886_v28 = vld [vmem:[%s5139_s3 + $0x324] ss:$16 sps:$4 sm:$0xff]   ;;  %v3887_v31 = vld [vmem:[%s5139_s3 + $0x328] ss:$16 sps:$4 sm:$0xff]  }
 0x1a8   :  { %v1624_v49 = vpack.c.bf16 %v1620_v43, %v1616_v41  ;;  %v4831_v50 = vpack.c.bf16 %v1622_v44, %v1618_v42  ;;  %v3892_v32 = vld [vmem:[%s5139_s3 + $0x344] ss:$16 sps:$4 sm:$0xff]   ;;  %v3895_v33 = vld [vmem:[%s5139_s3 + $0x34c] ss:$16 sps:$4 sm:$0xff]   ;;  %v3890_v34 = vld [vmem:[%s5139_s3 + $0x340] ss:$16 sps:$4 sm:$0xff]  }
 0x1a9   :  { %v1625_v51 = vpack.c.bf16 %v1621_v47, %v1617_v45  ;;  %v1627_v52 = vpack.c.bf16 %v1623_v48, %v1619_v46  ;;  %v3893_v35 = vld [vmem:[%s5139_s3 + $0x348] ss:$16 sps:$4 sm:$0xff]   ;;  %v3898_v36 = vld [vmem:[%s5139_s3 + $0x364] ss:$16 sps:$4 sm:$0xff]   ;;  %v3901_v37 = vld [vmem:[%s5139_s3 + $0x36c] ss:$16 sps:$4 sm:$0xff]  }
 0x1aa   :  { %v3896_v38 = vld [vmem:[%s5139_s3 + $0x360] ss:$16 sps:$4 sm:$0xff]   ;;  %v3899_v39 = vld [vmem:[%s5139_s3 + $0x368] ss:$16 sps:$4 sm:$0xff]   ;;  %v3904_v40 = vld [vmem:[%s5139_s3 + $0x384] ss:$16 sps:$4 sm:$0xff]  }
 0x1ab   :  { %2450 = vmatprep.mubr.bf16.mxu0 %v1625_v51  ;;  %2536 = vmatprep.mubr.bf16.mxu1 %v1625_v51  ;;  %v3907_v41 = vld [vmem:[%s5139_s3 + $0x38c] ss:$16 sps:$4 sm:$0xff]   ;;  %v3902_v42 = vld [vmem:[%s5139_s3 + $0x380] ss:$16 sps:$4 sm:$0xff]   ;;  %v3905_v43 = vld [vmem:[%s5139_s3 + $0x388] ss:$16 sps:$4 sm:$0xff]  }
 0x1ac   :  { %2451 = vmatmul.mubr.bf16.vlgmr.msra.gmra.mrb[4].mxu0 %v1624_v49  ;;  %2537 = vmatmul.mubr.bf16.vlgmr.msra.gmra.mrb[4].mxu1 %v1624_v49  ;;  %v3910_v44 = vld [vmem:[%s5139_s3 + $0x3a4] ss:$16 sps:$4 sm:$0xff]   ;;  %v3913_v45 = vld [vmem:[%s5139_s3 + $0x3ac] ss:$16 sps:$4 sm:$0xff]   ;;  %v3908_v46 = vld [vmem:[%s5139_s3 + $0x3a0] ss:$16 sps:$4 sm:$0xff]  }
 0x1ad   :  { %2462 = vmatpush1.bf16.msra.mxu0 %v3830_v53  ;;  %2548 = vmatpush1.bf16.msra.mxu1 %v3833_v54  ;;  %v3911_v47 = vld [vmem:[%s5139_s3 + $0x3a8] ss:$16 sps:$4 sm:$0xff]   ;;  %v3916_v48 = vld [vmem:[%s5139_s3 + $0x3c4] ss:$16 sps:$4 sm:$0xff]   ;;  %v3919_v49 = vld [vmem:[%s5139_s3 + $0x3cc] ss:$16 sps:$4 sm:$0xff]  }
 0x1ae   :  { %2493 = vmatprep.mubr.bf16.mxu0 %v1627_v52  ;;  %2579 = vmatprep.mubr.bf16.mxu1 %v1627_v52  ;;  %v3914_v51 = vld [vmem:[%s5139_s3 + $0x3c0] ss:$16 sps:$4 sm:$0xff]   ;;  %v3917_v52 = vld [vmem:[%s5139_s3 + $0x3c8] ss:$16 sps:$4 sm:$0xff]   ;;  %v3922_v53 = vld [vmem:[%s5139_s3 + $0x3e4] ss:$16 sps:$4 sm:$0xff]  }
 0x1af   :  { %2463 = vmatprep.subr.bf16.mxu0 %v3838_v55  ;;  %2549 = vmatprep.subr.bf16.mxu1 %v3841_v56  ;;  %v3925_v54 = vld [vmem:[%s5139_s3 + $0x3ec] ss:$16 sps:$4 sm:$0xff]   ;;  %v3920_v55 = vld [vmem:[%s5139_s3 + $0x3e0] ss:$16 sps:$4 sm:$0xff]   ;;  %v3923_v56 = vld [vmem:[%s5139_s3 + $0x3e8] ss:$16 sps:$4 sm:$0xff]  }
 0x1b1   :  { %2464 = vmatpush1.bf16.msra.mxu0 %v3836_v57  ;;  %2550 = vmatpush1.bf16.msra.mxu1 %v3839_v58  ;;  %v3926_v57 = vld [vmem:[%s5140_s5 + $0x40] sm:$0xff]  }
 0x1b2   :  { %2465 = vmatprep.subr.bf16.mxu0 %v3844_v59  ;;  %2551 = vmatprep.subr.bf16.mxu1 %v3847_v60  ;;  %v3927_v58 = vld [vmem:[%s5140_s5 + $0xc0] sm:$0xff]  }
 0x1b3   :  { %v3928_v59 = vld [vmem:[%s5140_s5] sm:$0xff]  }
 0x1b4   :  { %v3929_v60 = vld [vmem:[%s5140_s5 + $0x80] sm:$0xff]  }
 0x1b5   :  { %2466 = vmatpush1.bf16.msra.mxu0 %v3842_v61  ;;  %2552 = vmatpush1.bf16.msra.mxu1 %v3845_v62  ;;  %v3930_v61 = vld [vmem:[%s5140_s5 + $0x48] sm:$0xff]  }
 0x1b6   :  { %2467 = vmatprep.subr.bf16.mxu0 %v3850_v63  ;;  %2553 = vmatprep.subr.bf16.mxu1 %v3853_v0  ;;  %v3931_v62 = vld [vmem:[%s5140_s5 + $0xc8] sm:$0xff]  }
 0x1b7   :  { %v3932_v63 = vld [vmem:[%s5140_s5 + $0x8] sm:$0xff]  }
 0x1b8   :  { %v3933_v0 = vld [vmem:[%s5140_s5 + $0x88] sm:$0xff]  }
 0x1b9   :  { %2468 = vmatpush1.bf16.msra.mxu0 %v3848_v1  ;;  %2554 = vmatpush1.bf16.msra.mxu1 %v3851_v2  ;;  %v3934_v1 = vld [vmem:[%s5140_s5 + $0x50] sm:$0xff]  }
 0x1ba   :  { %2469 = vmatprep.subr.bf16.mxu0 %v3856_v3  ;;  %2555 = vmatprep.subr.bf16.mxu1 %v3859_v4  ;;  %v3936_v2 = vld [vmem:[%s5140_s5 + $0x10] sm:$0xff]   ;;  %v3938_v4 = vld [vmem:[%s5140_s5 + $0x58] sm:$0xff]  }
 0x1bb   :  { %v3937_v3 = vld [vmem:[%s5140_s5 + $0x90] sm:$0xff]  }
 0x1bd   :  { %2470 = vmatpush1.bf16.msra.mxu0 %v3854_v5  ;;  %2556 = vmatpush1.bf16.msra.mxu1 %v3857_v6  ;;  %v3939_v5 = vld [vmem:[%s5140_s5 + $0xd8] sm:$0xff]  }
 0x1be   :  { %2471 = vmatprep.subr.bf16.mxu0 %v3862_v7  ;;  %2557 = vmatprep.subr.bf16.mxu1 %v3865_v8  ;;  %v3940_v6 = vld [vmem:[%s5140_s5 + $0x18] sm:$0xff]   ;;  %v3942_v8 = vld [vmem:[%s5140_s5 + $0x60] sm:$0xff]  }
 0x1bf   :  { %v3941_v7 = vld [vmem:[%s5140_s5 + $0x98] sm:$0xff]  }
 0x1c1   :  { %2472 = vmatpush1.bf16.msra.mxu0 %v3860_v9  ;;  %2558 = vmatpush1.bf16.msra.mxu1 %v3863_v10  ;;  %v3943_v9 = vld [vmem:[%s5140_s5 + $0xe0] sm:$0xff]  }
 0x1c2   :  { %2473 = vmatprep.subr.bf16.mxu0 %v3868_v11  ;;  %2559 = vmatprep.subr.bf16.mxu1 %v3871_v12  ;;  %v3944_v10 = vld [vmem:[%s5140_s5 + $0x20] sm:$0xff]   ;;  %v3946_v12 = vld [vmem:[%s5140_s5 + $0x68] sm:$0xff]  }
 0x1c3   :  { %v3945_v11 = vld [vmem:[%s5140_s5 + $0xa0] sm:$0xff]  }
 0x1c5   :  { %2474 = vmatpush1.bf16.msra.mxu0 %v3866_v13  ;;  %2560 = vmatpush1.bf16.msra.mxu1 %v3869_v14  ;;  %v3947_v13 = vld [vmem:[%s5140_s5 + $0xe8] sm:$0xff]  }
 0x1c6   :  { %2475 = vmatprep.subr.bf16.mxu0 %v3874_v18  ;;  %2561 = vmatprep.subr.bf16.mxu1 %v3877_v21  ;;  %v3948_v14 = vld [vmem:[%s5140_s5 + $0x28] sm:$0xff]   ;;  %v3950_v21 = vld [vmem:[%s5140_s5 + $0x70] sm:$0xff]  }
 0x1c7   :  { %v3949_v18 = vld [vmem:[%s5140_s5 + $0xa8] sm:$0xff]  }
 0x1c9   :  { %2476 = vmatpush1.bf16.msra.mxu0 %v3872_v22  ;;  %2562 = vmatpush1.bf16.msra.mxu1 %v3875_v23  ;;  %v3951_v22 = vld [vmem:[%s5140_s5 + $0xf0] sm:$0xff]  }
 0x1ca   :  { %2477 = vmatprep.subr.bf16.mxu0 %v3880_v24  ;;  %2563 = vmatprep.subr.bf16.mxu1 %v3883_v25  ;;  %v3952_v23 = vld [vmem:[%s5140_s5 + $0x30] sm:$0xff]   ;;  %v3954_v25 = vld [vmem:[%s5140_s5 + $0x78] sm:$0xff]  }
 0x1cb   :  { %v3953_v24 = vld [vmem:[%s5140_s5 + $0xb0] sm:$0xff]  }
 0x1cd   :  { %2478 = vmatpush1.bf16.msra.mxu0 %v3878_v26  ;;  %2564 = vmatpush1.bf16.msra.mxu1 %v3881_v27  ;;  %v3955_v26 = vld [vmem:[%s5140_s5 + $0xf8] sm:$0xff]  }
 0x1ce   :  { %2479 = vmatprep.subr.bf16.mxu0 %v3886_v28  ;;  %2565 = vmatprep.subr.bf16.mxu1 %v3889_v29  ;;  %v3956_v27 = vld [vmem:[%s5140_s5 + $0x38] sm:$0xff]   ;;  %v1756_v29 = vld [vmem:[%s5142_s4] sm:$0xf] }
 0x1cf   :  { %v3957_v28 = vld [vmem:[%s5140_s5 + $0xb8] sm:$0xff]  }
 0x1d1   :  { %2480 = vmatpush1.bf16.msra.mxu0 %v3884_v30  ;;  %2566 = vmatpush1.bf16.msra.mxu1 %v3887_v31  ;;  %v1761_v30 = vrot.slane %v1756_v29, %v235_v16  ;;  %v1769_v31 = vrot.slane %v1756_v29, %v243_v17 }
 0x1d2   :  { %2481 = vmatprep.subr.bf16.mxu0 %v3892_v32  ;;  %2567 = vmatprep.subr.bf16.mxu1 %v3895_v33  ;;  %v1765_v32 = vrot.slane %v1756_v29, %v239_v19  ;;  %v1773_v33 = vrot.slane %v1756_v29, %v247_v20 }
 0x1d5   :  { %2482 = vmatpush1.bf16.msra.mxu0 %v3890_v34  ;;  %2568 = vmatpush1.bf16.msra.mxu1 %v3893_v35 }
 0x1d6   :  { %2483 = vmatprep.subr.bf16.mxu0 %v3898_v36  ;;  %2569 = vmatprep.subr.bf16.mxu1 %v3901_v37 }
 0x1d9   :  { %2484 = vmatpush1.bf16.msra.mxu0 %v3896_v38  ;;  %2570 = vmatpush1.bf16.msra.mxu1 %v3899_v39 }
 0x1da   :  { %2485 = vmatprep.subr.bf16.mxu0 %v3904_v40  ;;  %2571 = vmatprep.subr.bf16.mxu1 %v3907_v41 }
 0x1dd   :  { %2486 = vmatpush1.bf16.msra.mxu0 %v3902_v42  ;;  %2572 = vmatpush1.bf16.msra.mxu1 %v3905_v43 }
 0x1de   :  { %2487 = vmatprep.subr.bf16.mxu0 %v3910_v44  ;;  %2573 = vmatprep.subr.bf16.mxu1 %v3913_v45 }
 0x1e1   :  { %2488 = vmatpush1.bf16.msra.mxu0 %v3908_v46  ;;  %2574 = vmatpush1.bf16.msra.mxu1 %v3911_v47 }
 0x1e2   :  { %2489 = vmatprep.subr.bf16.mxu0 %v3916_v48  ;;  %2575 = vmatprep.subr.bf16.mxu1 %v3919_v49 }
 0x1e5   :  { %2490 = vmatpush1.bf16.msra.mxu0 %v3914_v51  ;;  %2576 = vmatpush1.bf16.msra.mxu1 %v3917_v52 }
 0x1e6   :  { %2491 = vmatprep.subr.bf16.mxu0 %v3922_v53  ;;  %2577 = vmatprep.subr.bf16.mxu1 %v3925_v54 }
 0x1e9   :  { %2492 = vmatpush1.bf16.msra.mxu0 %v3920_v55  ;;  %2578 = vmatpush1.bf16.msra.mxu1 %v3923_v56 }
 0x1ea   :  { %3337 = vmatprep.subr.bf16.mxu0 %v3926_v57  ;;  %3359 = vmatprep.subr.bf16.mxu1 %v3927_v58 }
 0x1ec   :  { %2494 = vmatmul.mubr.bf16.vlgmr.msra.gmra.mrb[4].mxu0 %v4831_v50  ;;  %2580 = vmatmul.mubr.bf16.vlgmr.msra.gmra.mrb[4].mxu1 %v4831_v50  ;;  %v3935_v50 = vld [vmem:[%s5140_s5 + $0xd0] sm:$0xff]  }
 0x1ed   :  { %3338 = vmatpush3.bf16.msra.mxu0 %v3928_v59  ;;  %3360 = vmatpush3.bf16.msra.mxu1 %v3929_v60  ;;  %v3304_v60 = vld [vmem:[%s5143_s6] ss:$0 sm:$0xff] }
 0x1ee   :  { %3339 = vmatprep.subr.bf16.mxu0 %v3930_v61  ;;  %3361 = vmatprep.subr.bf16.mxu1 %v3931_v62 }
 0x1f1   :  { %3340 = vmatpush3.bf16.msra.mxu0 %v3932_v63  ;;  %3362 = vmatpush3.bf16.msra.mxu1 %v3933_v0 }
 0x1f2   :  { %3341 = vmatprep.subr.bf16.mxu0 %v3934_v1  ;;  %3363 = vmatprep.subr.bf16.mxu1 %v3935_v50 }
 0x1f5   :  { %3342 = vmatpush3.bf16.msra.mxu0 %v3936_v2  ;;  %3364 = vmatpush3.bf16.msra.mxu1 %v3937_v3 }
 0x1f6   :  { %3343 = vmatprep.subr.bf16.mxu0 %v3938_v4  ;;  %3365 = vmatprep.subr.bf16.mxu1 %v3939_v5 }
 0x1f9   :  { %3344 = vmatpush3.bf16.msra.mxu0 %v3940_v6  ;;  %3366 = vmatpush3.bf16.msra.mxu1 %v3941_v7 }
 0x1fa   :  { %3345 = vmatprep.subr.bf16.mxu0 %v3942_v8  ;;  %3367 = vmatprep.subr.bf16.mxu1 %v3943_v9 }
 0x1fd   :  { %3346 = vmatpush3.bf16.msra.mxu0 %v3944_v10  ;;  %3368 = vmatpush3.bf16.msra.mxu1 %v3945_v11 }
 0x1fe   :  { %3347 = vmatprep.subr.bf16.mxu0 %v3946_v12  ;;  %3369 = vmatprep.subr.bf16.mxu1 %v3947_v13 }
 0x201   :  { %3348 = vmatpush3.bf16.msra.mxu0 %v3948_v14  ;;  %3370 = vmatpush3.bf16.msra.mxu1 %v3949_v18 }
 0x202   :  { %3349 = vmatprep.subr.bf16.mxu0 %v3950_v21  ;;  %3371 = vmatprep.subr.bf16.mxu1 %v3951_v22 }
 0x205   :  { %3350 = vmatpush3.bf16.msra.mxu0 %v3952_v23  ;;  %3372 = vmatpush3.bf16.msra.mxu1 %v3953_v24 }
 0x206   :  { %3351 = vmatprep.subr.bf16.mxu0 %v3954_v25  ;;  %3373 = vmatprep.subr.bf16.mxu1 %v3955_v26 }
 0x209   :  { %3352 = vmatpush3.bf16.msra.mxu0 %v3956_v27  ;;  %3374 = vmatpush3.bf16.msra.mxu1 %v3957_v28 }
 0x2bf   :  { %v2495_v34 = vpop.f32.mrb[4].mxu0  ;;  %v2581_v35 = vpop.f32.mrb[4].mxu1 }
 0x2c0   :  { %v3389_v36 = vadd.f32 %v2495_v34, %v1761_v30  ;;  %v3393_v37 = vadd.f32 %v2581_v35, %v1769_v31  ;;  %v2497_v38 = vpop.f32.mrb[5].mxu0  ;;  %v2583_v39 = vpop.f32.mrb[5].mxu1 }
 0x2c1   :  { %v3390_v40 = vadd.f32 %v2497_v38, %v1765_v32  ;;  %v3394_v41 = vadd.f32 %v2583_v39, %v1773_v33  ;;  %v2499_v42 = vpop.f32.mrb[6].mxu0  ;;  %v2585_v43 = vpop.f32.mrb[6].mxu1 }
 0x2c2   :  { %v3391_v16 = vadd.f32 %v2499_v42, %v1761_v30  ;;  %v3395_v44 = vadd.f32 %v2585_v43, %v1769_v31  ;;  %v2501_v45 = vpop.f32.mrb[7].mxu0  ;;  %v2587_v17 = vpop.f32.mrb[7].mxu1  ;;  %v2590_v19 = vmax.f32 %v3389_v36, 0.0  ;;  %v2592_v48 = vmax.f32 %v3393_v37, 0.0 }
 0x2c3   :  { %v3392_v46 = vadd.f32 %v2501_v45, %v1765_v32  ;;  %v3396_v47 = vadd.f32 %v2587_v17, %v1773_v33  ;;  %v2591_v49 = vmax.f32 %v3390_v40, 0.0  ;;  %v2593_v51 = vmax.f32 %v3394_v41, 0.0 }
 0x2c4   :  { %v2594_v15 = vmax.f32 %v3391_v16, 0.0  ;;  %v2596_v20 = vmax.f32 %v3395_v44, 0.0 }
 0x2c5   :  { %v2595_v52 = vmax.f32 %v3392_v46, 0.0  ;;  %v2597_v53 = vmax.f32 %v3396_v47, 0.0 }
 0x2c6   :  { %v2598_v54 = vpack.c.bf16 %v2594_v15, %v2590_v19  ;;  %v2600_v55 = vpack.c.bf16 %v2596_v20, %v2592_v48 }
 0x2c7   :  { %v2599_v56 = vpack.c.bf16 %v2595_v52, %v2591_v49  ;;  %v2601_v57 = vpack.c.bf16 %v2597_v53, %v2593_v51 }
 0x2c9   :  { %2897 = vmatprep.mubr.bf16.mxu0 %v2599_v56  ;;  %2938 = vmatprep.mubr.bf16.mxu1 %v2601_v57 }
 0x2ca   :  { %2898 = vmatmul.mubr.bf16.vlgmr.msra.gmra.mrb[8].mxu0 %v2598_v54  ;;  %2939 = vmatmul.mubr.bf16.vlgmr.msra.gmra.mrb[8].mxu1 %v2600_v55 }
 0x39d   :  { %v3353_v58 = vpop.f32.mrb[8].mxu0  ;;  %v3375_v59 = vpop.f32.mrb[8].mxu1 }
 0x39e   :  { %v3354_v61 = vpop.f32.mrb[9].mxu0  ;;  %v3376_v62 = vpop.f32.mrb[9].mxu1 }
 0x39f   :  { %v3355_v63 = vadd.f32 %v3354_v61, %v3353_v58  ;;  %v3377_v0 = vadd.f32 %v3376_v62, %v3375_v59  ;;  %v3356_v1 = vpop.f32.mrb[10].mxu0  ;;  %v3378_v50 = vpop.f32.mrb[10].mxu1 }
 0x3a0   :  { %v3357_v2 = vpop.f32.mrb[11].mxu0  ;;  %v3379_v3 = vpop.f32.mrb[11].mxu1 }
 0x3a1   :  { %v2900_v4 = vadd.f32 %v3355_v63, %v3304_v60  ;;  %v3358_v5 = vadd.f32 %v3357_v2, %v3356_v1  ;;  %v3380_v6 = vadd.f32 %v3379_v3, %v3378_v50 }
 0x3a3   :  { %v2903_v7 = vadd.f32 %v3358_v5, %v3304_v60  ;;  %v2941_v8 = vadd.f32 %v3377_v0, %v2900_v4 }
 0x3a5   :  { %2947 = vmax.xlane.f32.xlu0 %v2941_v8  ;;  %v2944_v9 = vadd.f32 %v3380_v6, %v2903_v7 }
 0x3a9   :  { %2949 = vmax.xlane.f32.xlu0 %v2944_v9 }
 0x432   :  { %v2948_v10 = vpop.xlane.xlu0 %2947 }
 0x433   :  { %v2951_v11 = vsub.f32 %v2941_v8, %v2948_v10 }
 0x435   :  { %v2953_v12 = vmul.f32 1.442695, %v2951_v11 }
 0x436   :  { %v2950_v13 = vpop.xlane.xlu0 %2949 }
 0x437   :  { %3958 = vpow2.f32 %v2953_v12  ;;  %v2952_v14 = vsub.f32 %v2944_v9, %v2950_v13 }
 0x439   :  { %v2955_v18 = vmul.f32 1.442695, %v2952_v14 }
 0x43b   :  { %3960 = vpow2.f32 %v2955_v18 }
 0x441   :  { %v3959_v21 = vpop.eup %3958 }
 0x442   :  { %2957 = vadd.xlane.f32.xlu1 %v3959_v21 }
 0x445   :  { %v3961_v22 = vpop.eup %3960 }
 0x446   :  { %2959 = vadd.xlane.f32.xlu1 %v3961_v22 }
 0x4cf   :  { %v2958_v23 = vpop.xlane.xlu1 %2957 }
 0x4d0   :  { %3962 = vrcp.f32 %v2958_v23 }
 0x4d3   :  { %v2960_v24 = vpop.xlane.xlu1 %2959 }
 0x4d4   :  { %3964 = vrcp.f32 %v2960_v24 }
 0x4da   :  { %v3963_v25 = vpop.eup %3962 }
 0x4db   :  { %v2962_v26 = vmul.f32 %v3963_v25, %v3959_v21 }
 0x4dd   :  { %2965 = vst [vmem:[%s5144_s7] sm:$0xff] %v2962_v26 }
 0x4de   :  { %v3965_v27 = vpop.eup %3964 }
 0x4df   :  { %v2964_v28 = vmul.f32 %v3965_v27, %v3961_v22 }
 0x4e1   :  { %2966 = vst [vmem:[%s5144_s7 + $0x8] sm:$0xff] %v2964_v28 }

</bundles_post_ra>
